<compile_context>
chip_gen: v7x
topology: tpu7x:2x2x1
jax: 0.10.0
libtpu: 0.0.40
codegen_flags: <defaults>
</compile_context>

<pallas_src>
import functools

import jax
import jax.numpy as jnp
from jax.experimental import pallas as pl
from jax.experimental.pallas import tpu as pltpu

LANE = 128


def binomial_coeff(alpha: float, j: int) -> float:
    if j < 0:
        return 0.0
    coeff = 1.0
    for i in range(j):
        coeff *= (alpha - i) / (i + 1)
    return coeff


def _round_up(n: int, m: int) -> int:
    return ((n + m - 1) // m) * m


def _fsmm_kernel(scal_ref, x_ref, wihf_ref, whhf_ref, wihb_ref, b_ref,
                 fc_ref, w1_ref, b1_ref, w2_ref, coef_ref, o_ref,
                 *, T, L, D, valid, start, alpha, out_cols):
    TM = o_ref.shape[0]
    P = x_ref.shape[2]
    f32 = jnp.float32

    r1 = scal_ref[0]      # R1
    c1 = scal_ref[1]      # C1
    fc_b = scal_ref[2]    # RNN head bias (scalar)
    w2_b = scal_ref[3]    # f_f_soc2 bias (scalar)

    # ---- stacked tanh-RNN, time-major; only the LAST-step hidden of every
    #      layer is needed (for soc and its input gradient). ----
    def step(t, hs):
        inp = x_ref[t]                                          # (TM, P)
        new_hs = []
        for l in range(L):
            z = (jnp.dot(inp, wihf_ref[l], preferred_element_type=f32)
                 + jnp.dot(hs[l], whhf_ref[l], preferred_element_type=f32)
                 + b_ref[l])                                    # (TM, P)
            h = jnp.tanh(z)
            new_hs.append(h)
            inp = h
        return tuple(new_hs)

    hs0 = tuple(jnp.zeros((TM, P), f32) for _ in range(L))
    hs = jax.lax.fori_loop(0, T, step, hs0, unroll=True)

    h_last = hs[L - 1]
    fc_row = fc_ref[...]                                        # (1, P)
    soc = jnp.sum(h_last * fc_row, axis=1, keepdims=True) + fc_b  # (TM, 1)

    # ---- analytic d soc / d x[:, -1, D-1] (== torch.autograd.grad path). ----
    g = fc_row * (1.0 - h_last * h_last)                        # (TM, P)
    for l in range(L - 1, 0, -1):
        g = jnp.dot(g, wihb_ref[l], preferred_element_type=f32)
        g = g * (1.0 - hs[l - 1] * hs[l - 1])
    dx = jnp.dot(g, wihb_ref[0], preferred_element_type=f32)    # (TM, P)
    d_soc = dx[:, D - 1:D]                                      # (TM, 1)

    # ---- f_soc = Linear(H,1)(Linear(1,H)(soc)), no activation. ----
    f1 = soc * w1_ref[...] + b1_ref[...]                        # (TM, P)
    f_soc = jnp.sum(f1 * w2_ref[...], axis=1, keepdims=True) + w2_b

    # ---- fractional Up term at the last time step (only element used). ----
    volt_last = x_ref[T - 1][:, 0:1]
    cur_last = x_ref[T - 1][:, 1:2]
    cols = [x_ref[start + j][:, 0:1] for j in range(valid)]
    volt_win = jnp.concatenate(cols, axis=1)                    # (TM, valid)
    hist = jnp.sum(volt_win * coef_ref[...], axis=1, keepdims=True)
    if valid > 1:
        tdiff = (x_ref[T - 1][:, 3:4] - x_ref[start][:, 3:4]) / float(valid - 1)
    else:
        tdiff = jnp.ones((TM, 1), f32)
    if alpha == 0.5:
        ts = jnp.sqrt(tdiff)
    elif alpha == 1.0:
        ts = tdiff
    else:
        ts = jnp.exp(alpha * jnp.log(tdiff))    # == tdiff ** alpha for tdiff > 0
    a = -ts / (r1 * c1)
    b_val = ts / c1 * cur_last
    up_last = a * volt_last + b_val - hist                      # (TM, 1)

    # ---- one lane-dense output slab: [soc, d_soc, f_soc, Up_last, 0...]. ----
    packed = jnp.concatenate(
        [soc, d_soc, f_soc, up_last,
         jnp.zeros((TM, out_cols - 4), f32)], axis=1)
    o_ref[...] = packed


def fsmm_rnn_forward(x, params, *, alpha=0.5, window=10):
    """x: (B, T, D) float32, D >= 4 (col 0: voltage, 1: current, 3: time).
    Returns (soc, loss1, loss2) with the same shapes/values as Fsmm_rnn.forward."""
    B, T, D = x.shape
    H = params["w_hh"][0].shape[0]
    L = len(params["w_ih"])
    P = max(_round_up(D, LANE), _round_up(H, LANE))
    f32 = jnp.float32

    # Batch tiling: up to 256 rows per tile, weights pinned in VMEM across steps.
    TM = min(256, _round_up(B, 8))
    B_pad = _round_up(B, TM)
    grid = (B_pad // TM,)

    def pad2(a, r, c):
        a = jnp.asarray(a, f32)
        return jnp.pad(a, ((0, r - a.shape[0]), (0, c - a.shape[1])))

    wih_fwd = jnp.stack([pad2(w.T, P, P) for w in params["w_ih"]])   # (L,P,P) in->out
    wih_bwd = jnp.stack([pad2(w, P, P) for w in params["w_ih"]])     # (L,P,P) out->in
    whh_fwd = jnp.stack([pad2(w.T, P, P) for w in params["w_hh"]])   # (L,P,P)
    b_rnn = jnp.stack([pad2((bi + bh)[None, :], 1, P)
                       for bi, bh in zip(params["b_ih"], params["b_hh"])])  # (L,1,P)
    fc_row = pad2(params["fc_w"], 1, P)                              # (1,P)
    w1_row = pad2(params["w1"].T, 1, P)                              # (1,P)
    b1_row = pad2(params["b1"][None, :], 1, P)                       # (1,P)
    w2_row = pad2(params["w2"], 1, P)                                # (1,P)

    valid = min(T, window)
    start = T - valid
    coeffs = jnp.asarray(params["binom"], f32)[window + 1 - valid:window + 1]
    coeffs = coeffs.reshape(1, valid)

    scal = jnp.stack([jnp.asarray(params["R1"], f32).reshape(()),
                      jnp.asarray(params["C1"], f32).reshape(()),
                      jnp.asarray(params["fc_b"], f32).reshape(()),
                      jnp.asarray(params["b2"], f32).reshape(())])

    xp = jnp.pad(jnp.asarray(x, f32), ((0, B_pad - B), (0, 0), (0, P - D)))
    xt = jnp.transpose(xp, (1, 0, 2))                                # (T, B_pad, P)

    OUTC = LANE
    kernel = functools.partial(
        _fsmm_kernel, T=T, L=L, D=D, valid=valid, start=start,
        alpha=float(alpha), out_cols=OUTC)

    cost = pl.CostEstimate(
        flops=int((4 * T * L + 2 * L + 2) * B_pad * P * P),
        transcendentals=int(B_pad * T * L * P + B_pad),
        bytes_accessed=int(xt.size * 4 + 3 * L * P * P * 4 + B_pad * OUTC * 4))

    def full(a):
        return pl.BlockSpec(a.shape, lambda i, n=a.ndim: (0,) * n)

    out = pl.pallas_call(
        kernel,
        out_shape=jax.ShapeDtypeStruct((B_pad, OUTC), f32),
        grid=grid,
        in_specs=[
            pl.BlockSpec(memory_space=pltpu.MemorySpace.SMEM),       # scalars
            pl.BlockSpec((T, TM, P), lambda i: (0, i, 0)),           # x (time-major)
            full(wih_fwd), full(whh_fwd), full(wih_bwd), full(b_rnn),
            full(fc_row), full(w1_row), full(b1_row), full(w2_row),
            full(coeffs),
        ],
        out_specs=pl.BlockSpec((TM, OUTC), lambda i: (i, 0)),
        compiler_params=pltpu.CompilerParams(
            dimension_semantics=("parallel",),
            vmem_limit_bytes=32 * 1024 * 1024),
        cost_estimate=cost,
    )(scal, xt, wih_fwd, whh_fwd, wih_bwd, b_rnn,
      fc_row, w1_row, b1_row, w2_row, coeffs)

    soc = out[:B, 0:1]
    d_soc = out[:B, 1]          # (B,)
    f_soc = out[:B, 2:3]
    up_last = out[:B, 3]        # (B,)

    lamada_i = params["delta"] / params["Q"] * x[:, -1, 1:2]
    loss1 = lamada_i + d_soc                      # (B,1)+(B,) -> (B,B), as in torch
    loss2 = f_soc - x[:, -1, 0:1] - params["R0"] * x[:, -1, 1:2] - up_last
    return soc, loss1, loss2


# ---------------- pure-JAX reference (uses jax.grad for d_soc) ----------------
def _ref_soc(x, params):
    B, T, D = x.shape
    L = len(params["w_ih"])
    H = params["w_hh"][0].shape[0]
    hs = [jnp.zeros((B, H), jnp.float32) for _ in range(L)]
    for t in range(T):
        inp = x[:, t, :]
        for l in range(L):
            z = (jnp.dot(inp, params["w_ih"][l].T) + params["b_ih"][l]
                 + jnp.dot(hs[l], params["w_hh"][l].T) + params["b_hh"][l])
            hs[l] = jnp.tanh(z)
            inp = hs[l]
    return jnp.dot(hs[-1], params["fc_w"].T) + params["fc_b"]


def _ref_forward(x, params, alpha, window):
    B, T, D = x.shape
    soc = _ref_soc(x, params)
    d_soc = jax.grad(lambda xx: jnp.sum(_ref_soc(xx, params)))(x)[:, -1, -1]
    lamada_i = params["delta"] / params["Q"] * x[:, -1, 1:2]
    loss1 = lamada_i + d_soc
    f_soc = jnp.dot(jnp.dot(soc, params["w1"].T) + params["b1"],
                    params["w2"].T) + params["b2"]
    valid = min(T, window)
    start = T - valid
    coeffs = params["binom"][window + 1 - valid:window + 1]
    hist = jnp.dot(x[:, start:T, 0], coeffs)[:, None]
    if valid > 1:
        tdiff = (x[:, T - 1, 3] - x[:, start, 3]) / (valid - 1)
    else:
        tdiff = jnp.ones((B,), jnp.float32)
    ts = (tdiff ** alpha)[:, None]
    a = -ts / (params["R1"] * params["C1"])
    b_val = ts / params["C1"] * x[:, T - 1, 1][:, None]
    up_last = (a * x[:, T - 1, 0][:, None] + b_val - hist)[:, 0]
    loss2 = f_soc - x[:, -1, 0:1] - params["R0"] * x[:, -1, 1:2] - up_last
    return soc, loss1, loss2


def init_params(key, input_size, hidden_size, num_layers, *, window=10, alpha=0.5):
    f32 = jnp.float32
    ks = iter(jax.random.split(key, 4 * num_layers + 8))

    def u(shape, bound):
        return jax.random.uniform(next(ks), shape, f32, -bound, bound)

    kb = 1.0 / float(hidden_size) ** 0.5
    w_ih, w_hh, b_ih, b_hh = [], [], [], []
    for l in range(num_layers):
        in_dim = input_size if l == 0 else hidden_size
        w_ih.append(u((hidden_size, in_dim), kb))
        w_hh.append(u((hidden_size, hidden_size), kb))
        b_ih.append(u((hidden_size,), kb))
        b_hh.append(u((hidden_size,), kb))
    fc_w = u((1, hidden_size), kb)
    fc_b = u((1,), kb)
    w1 = u((hidden_size, 1), 1.0)       # f_f_soc1 = Linear(1, H): fan_in = 1
    b1 = u((hidden_size,), 1.0)
    w2 = u((1, hidden_size), kb)        # f_f_soc2 = Linear(H, 1)
    b2 = u((1,), kb)
    binom = jnp.asarray([(-1.0) ** j * binomial_coeff(alpha, j)
                         for j in range(window + 1)], f32)
    return dict(w_ih=w_ih, w_hh=w_hh, b_ih=b_ih, b_hh=b_hh,
                fc_w=fc_w, fc_b=fc_b, w1=w1, b1=b1, w2=w2, b2=b2,
                Q=jnp.asarray(2.9, f32), delta=jnp.asarray(1.0, f32),
                U0=jnp.asarray(1.0, f32), R0=jnp.asarray(1.0, f32),
                C1=jnp.asarray(1.0, f32), R1=jnp.asarray(1.0, f32),
                binom=binom)


if __name__ == "__main__":
    B, T, D = 2, 8, 4          # batch, sequence length, features (V, I, aux, time)
    H, L = 32, 2               # hidden size, RNN layers
    alpha, window = 0.5, 10

    key = jax.random.PRNGKey(0)
    kp, kx = jax.random.split(key)
    params = init_params(kp, D, H, L, window=window, alpha=alpha)

    x = jax.random.normal(kx, (B, T, D), jnp.float32)
    # Monotone positive "time" channel (index 3) so time_diff ** alpha stays real,
    # matching the battery-data setting this model targets.
    t_axis = 1.0 + 0.5 * jnp.arange(T, dtype=jnp.float32)
    x = x.at[:, :, 3].set(jnp.broadcast_to(t_axis, (B, T)))

    soc, loss1, loss2 = fsmm_rnn_forward(x, params, alpha=alpha, window=window)
    jax.block_until_ready((soc, loss1, loss2))

    with jax.default_matmul_precision("highest"):
        soc_r, loss1_r, loss2_r = _ref_forward(x, params, alpha, window)
    soc_r, loss1_r, loss2_r = jax.block_until_ready((soc_r, loss1_r, loss2_r))

    assert soc.shape == (B, 1) and loss1.shape == (B, B) and loss2.shape == (B, B)
    for got, ref in ((soc, soc_r), (loss1, loss1_r), (loss2, loss2_r)):
        assert jnp.allclose(got, ref, atol=5e-3, rtol=5e-3), (got, ref)

    print("KERNEL_OK")
</pallas_src>

<mosaic_0001>
module attributes {stable_mosaic.version = 11 : i64} {
  func.func @_fsmm_kernel(%arg0: i32, %arg1: memref<4xf32, #tpu.memory_space<smem>>, %arg2: memref<8x8x128xf32, #tpu.memory_space<vmem>>, %arg3: memref<2x128x128xf32, #tpu.memory_space<vmem>>, %arg4: memref<2x128x128xf32, #tpu.memory_space<vmem>>, %arg5: memref<2x128x128xf32, #tpu.memory_space<vmem>>, %arg6: memref<2x1x128xf32, #tpu.memory_space<vmem>>, %arg7: memref<1x128xf32, #tpu.memory_space<vmem>>, %arg8: memref<1x128xf32, #tpu.memory_space<vmem>>, %arg9: memref<1x128xf32, #tpu.memory_space<vmem>>, %arg10: memref<1x128xf32, #tpu.memory_space<vmem>>, %arg11: memref<1x8xf32, #tpu.memory_space<vmem>>, %arg12: memref<8x128xf32, #tpu.memory_space<vmem>>) attributes {dimension_semantics = [#tpu.dimension_semantics<parallel>], iteration_bounds = array<i64: 1>, scalar_prefetch = 0 : i64, scratch_operands = 0 : i64, tpu.core_type = #tpu.core_type<tc>, window_params = [{transform_indices = @transform_0, window_bounds = array<i64: 4>}, {transform_indices = @transform_1, window_bounds = array<i64: 8, 8, 128>}, {pipeline_mode = #tpu.pipeline_mode<synchronous>, transform_indices = @transform_2, window_bounds = array<i64: 2, 128, 128>}, {pipeline_mode = #tpu.pipeline_mode<synchronous>, transform_indices = @transform_3, window_bounds = array<i64: 2, 128, 128>}, {pipeline_mode = #tpu.pipeline_mode<synchronous>, transform_indices = @transform_4, window_bounds = array<i64: 2, 128, 128>}, {pipeline_mode = #tpu.pipeline_mode<synchronous>, transform_indices = @transform_5, window_bounds = array<i64: 2, 1, 128>}, {pipeline_mode = #tpu.pipeline_mode<synchronous>, transform_indices = @transform_6, window_bounds = array<i64: 1, 128>}, {pipeline_mode = #tpu.pipeline_mode<synchronous>, transform_indices = @transform_7, window_bounds = array<i64: 1, 128>}, {pipeline_mode = #tpu.pipeline_mode<synchronous>, transform_indices = @transform_8, window_bounds = array<i64: 1, 128>}, {pipeline_mode = #tpu.pipeline_mode<synchronous>, transform_indices = @transform_9, window_bounds = array<i64: 1, 128>}, {pipeline_mode = #tpu.pipeline_mode<synchronous>, transform_indices = @transform_10, window_bounds = array<i64: 1, 8>}, {transform_indices = @transform_11, window_bounds = array<i64: 8, 128>}]} {
    %c0 = arith.constant 0 : index
    %0 = memref.load %arg1[%c0] : memref<4xf32, #tpu.memory_space<smem>>
    %c1 = arith.constant 1 : index
    %1 = memref.load %arg1[%c1] : memref<4xf32, #tpu.memory_space<smem>>
    %c2 = arith.constant 2 : index
    %2 = memref.load %arg1[%c2] : memref<4xf32, #tpu.memory_space<smem>>
    %c3 = arith.constant 3 : index
    %3 = memref.load %arg1[%c3] : memref<4xf32, #tpu.memory_space<smem>>
    %cst = arith.constant 0.000000e+00 : f32
    %4 = vector.broadcast %cst : f32 to vector<8x128xf32>
    %cst_0 = arith.constant 0.000000e+00 : f32
    %5 = vector.broadcast %cst_0 : f32 to vector<8x128xf32>
    %c0_i32 = arith.constant 0 : i32
    %6 = arith.index_cast %c0_i32 : i32 to index
    %c0_1 = arith.constant 0 : index
    %c0_2 = arith.constant 0 : index
    %7 = vector.load %arg2[%6, %c0_1, %c0_2] : memref<8x8x128xf32, #tpu.memory_space<vmem>>, vector<1x8x128xf32>
    %8 = vector.shape_cast %7 : vector<1x8x128xf32> to vector<8x128xf32>
    %c0_3 = arith.constant 0 : index
    %c0_4 = arith.constant 0 : index
    %c0_5 = arith.constant 0 : index
    %9 = vector.load %arg3[%c0_3, %c0_4, %c0_5] : memref<2x128x128xf32, #tpu.memory_space<vmem>>, vector<1x128x128xf32>
    %10 = vector.shape_cast %9 : vector<1x128x128xf32> to vector<128x128xf32>
    %cst_6 = arith.constant dense<0.000000e+00> : vector<8x128xf32>
    %11 = tpu.matmul %8, %10, %cst_6 {dimension_numbers = #tpu.dot_dimension_numbers<[1], [0], [0], [1], [0, 0, 1, 1], [], []>} : vector<8x128xf32>, vector<128x128xf32>, vector<8x128xf32> -> vector<8x128xf32>
    %c0_7 = arith.constant 0 : index
    %c0_8 = arith.constant 0 : index
    %c0_9 = arith.constant 0 : index
    %12 = vector.load %arg4[%c0_7, %c0_8, %c0_9] : memref<2x128x128xf32, #tpu.memory_space<vmem>>, vector<1x128x128xf32>
    %13 = vector.shape_cast %12 : vector<1x128x128xf32> to vector<128x128xf32>
    %cst_10 = arith.constant dense<0.000000e+00> : vector<8x128xf32>
    %14 = tpu.matmul %4, %13, %cst_10 {dimension_numbers = #tpu.dot_dimension_numbers<[1], [0], [0], [1], [0, 0, 1, 1], [], []>} : vector<8x128xf32>, vector<128x128xf32>, vector<8x128xf32> -> vector<8x128xf32>
    %15 = arith.addf %11, %14 : vector<8x128xf32>
    %c0_11 = arith.constant 0 : index
    %c0_12 = arith.constant 0 : index
    %c0_13 = arith.constant 0 : index
    %16 = vector.load %arg6[%c0_11, %c0_12, %c0_13] : memref<2x1x128xf32, #tpu.memory_space<vmem>>, vector<1x1x128xf32>
    %17 = vector.shape_cast %16 : vector<1x1x128xf32> to vector<1x128xf32>
    %18 = vector.broadcast %17 : vector<1x128xf32> to vector<8x128xf32>
    %19 = arith.addf %15, %18 : vector<8x128xf32>
    %20 = math.tanh %19 : vector<8x128xf32>
    %c1_14 = arith.constant 1 : index
    %c0_15 = arith.constant 0 : index
    %c0_16 = arith.constant 0 : index
    %21 = vector.load %arg3[%c1_14, %c0_15, %c0_16] : memref<2x128x128xf32, #tpu.memory_space<vmem>>, vector<1x128x128xf32>
    %22 = vector.shape_cast %21 : vector<1x128x128xf32> to vector<128x128xf32>
    %cst_17 = arith.constant dense<0.000000e+00> : vector<8x128xf32>
    %23 = tpu.matmul %20, %22, %cst_17 {dimension_numbers = #tpu.dot_dimension_numbers<[1], [0], [0], [1], [0, 0, 1, 1], [], []>} : vector<8x128xf32>, vector<128x128xf32>, vector<8x128xf32> -> vector<8x128xf32>
    %c1_18 = arith.constant 1 : index
    %c0_19 = arith.constant 0 : index
    %c0_20 = arith.constant 0 : index
    %24 = vector.load %arg4[%c1_18, %c0_19, %c0_20] : memref<2x128x128xf32, #tpu.memory_space<vmem>>, vector<1x128x128xf32>
    %25 = vector.shape_cast %24 : vector<1x128x128xf32> to vector<128x128xf32>
    %cst_21 = arith.constant dense<0.000000e+00> : vector<8x128xf32>
    %26 = tpu.matmul %5, %25, %cst_21 {dimension_numbers = #tpu.dot_dimension_numbers<[1], [0], [0], [1], [0, 0, 1, 1], [], []>} : vector<8x128xf32>, vector<128x128xf32>, vector<8x128xf32> -> vector<8x128xf32>
    %27 = arith.addf %23, %26 : vector<8x128xf32>
    %c1_22 = arith.constant 1 : index
    %c0_23 = arith.constant 0 : index
    %c0_24 = arith.constant 0 : index
    %28 = vector.load %arg6[%c1_22, %c0_23, %c0_24] : memref<2x1x128xf32, #tpu.memory_space<vmem>>, vector<1x1x128xf32>
    %29 = vector.shape_cast %28 : vector<1x1x128xf32> to vector<1x128xf32>
    %30 = vector.broadcast %29 : vector<1x128xf32> to vector<8x128xf32>
    %31 = arith.addf %27, %30 : vector<8x128xf32>
    %32 = math.tanh %31 : vector<8x128xf32>
    %c1_i32 = arith.constant 1 : i32
    %33 = arith.index_cast %c1_i32 : i32 to index
    %c0_25 = arith.constant 0 : index
    %c0_26 = arith.constant 0 : index
    %34 = vector.load %arg2[%33, %c0_25, %c0_26] : memref<8x8x128xf32, #tpu.memory_space<vmem>>, vector<1x8x128xf32>
    %35 = vector.shape_cast %34 : vector<1x8x128xf32> to vector<8x128xf32>
    %c0_27 = arith.constant 0 : index
    %c0_28 = arith.constant 0 : index
    %c0_29 = arith.constant 0 : index
    %36 = vector.load %arg3[%c0_27, %c0_28, %c0_29] : memref<2x128x128xf32, #tpu.memory_space<vmem>>, vector<1x128x128xf32>
    %37 = vector.shape_cast %36 : vector<1x128x128xf32> to vector<128x128xf32>
    %cst_30 = arith.constant dense<0.000000e+00> : vector<8x128xf32>
    %38 = tpu.matmul %35, %37, %cst_30 {dimension_numbers = #tpu.dot_dimension_numbers<[1], [0], [0], [1], [0, 0, 1, 1], [], []>} : vector<8x128xf32>, vector<128x128xf32>, vector<8x128xf32> -> vector<8x128xf32>
    %c0_31 = arith.constant 0 : index
    %c0_32 = arith.constant 0 : index
    %c0_33 = arith.constant 0 : index
    %39 = vector.load %arg4[%c0_31, %c0_32, %c0_33] : memref<2x128x128xf32, #tpu.memory_space<vmem>>, vector<1x128x128xf32>
    %40 = vector.shape_cast %39 : vector<1x128x128xf32> to vector<128x128xf32>
    %cst_34 = arith.constant dense<0.000000e+00> : vector<8x128xf32>
    %41 = tpu.matmul %20, %40, %cst_34 {dimension_numbers = #tpu.dot_dimension_numbers<[1], [0], [0], [1], [0, 0, 1, 1], [], []>} : vector<8x128xf32>, vector<128x128xf32>, vector<8x128xf32> -> vector<8x128xf32>
    %42 = arith.addf %38, %41 : vector<8x128xf32>
    %c0_35 = arith.constant 0 : index
    %c0_36 = arith.constant 0 : index
    %c0_37 = arith.constant 0 : index
    %43 = vector.load %arg6[%c0_35, %c0_36, %c0_37] : memref<2x1x128xf32, #tpu.memory_space<vmem>>, vector<1x1x128xf32>
    %44 = vector.shape_cast %43 : vector<1x1x128xf32> to vector<1x128xf32>
    %45 = vector.broadcast %44 : vector<1x128xf32> to vector<8x128xf32>
    %46 = arith.addf %42, %45 : vector<8x128xf32>
    %47 = math.tanh %46 : vector<8x128xf32>
    %c1_38 = arith.constant 1 : index
    %c0_39 = arith.constant 0 : index
    %c0_40 = arith.constant 0 : index
    %48 = vector.load %arg3[%c1_38, %c0_39, %c0_40] : memref<2x128x128xf32, #tpu.memory_space<vmem>>, vector<1x128x128xf32>
    %49 = vector.shape_cast %48 : vector<1x128x128xf32> to vector<128x128xf32>
    %cst_41 = arith.constant dense<0.000000e+00> : vector<8x128xf32>
    %50 = tpu.matmul %47, %49, %cst_41 {dimension_numbers = #tpu.dot_dimension_numbers<[1], [0], [0], [1], [0, 0, 1, 1], [], []>} : vector<8x128xf32>, vector<128x128xf32>, vector<8x128xf32> -> vector<8x128xf32>
    %c1_42 = arith.constant 1 : index
    %c0_43 = arith.constant 0 : index
    %c0_44 = arith.constant 0 : index
    %51 = vector.load %arg4[%c1_42, %c0_43, %c0_44] : memref<2x128x128xf32, #tpu.memory_space<vmem>>, vector<1x128x128xf32>
    %52 = vector.shape_cast %51 : vector<1x128x128xf32> to vector<128x128xf32>
    %cst_45 = arith.constant dense<0.000000e+00> : vector<8x128xf32>
    %53 = tpu.matmul %32, %52, %cst_45 {dimension_numbers = #tpu.dot_dimension_numbers<[1], [0], [0], [1], [0, 0, 1, 1], [], []>} : vector<8x128xf32>, vector<128x128xf32>, vector<8x128xf32> -> vector<8x128xf32>
    %54 = arith.addf %50, %53 : vector<8x128xf32>
    %c1_46 = arith.constant 1 : index
    %c0_47 = arith.constant 0 : index
    %c0_48 = arith.constant 0 : index
    %55 = vector.load %arg6[%c1_46, %c0_47, %c0_48] : memref<2x1x128xf32, #tpu.memory_space<vmem>>, vector<1x1x128xf32>
    %56 = vector.shape_cast %55 : vector<1x1x128xf32> to vector<1x128xf32>
    %57 = vector.broadcast %56 : vector<1x128xf32> to vector<8x128xf32>
    %58 = arith.addf %54, %57 : vector<8x128xf32>
    %59 = math.tanh %58 : vector<8x128xf32>
    %c2_i32 = arith.constant 2 : i32
    %60 = arith.index_cast %c2_i32 : i32 to index
    %c0_49 = arith.constant 0 : index
    %c0_50 = arith.constant 0 : index
    %61 = vector.load %arg2[%60, %c0_49, %c0_50] : memref<8x8x128xf32, #tpu.memory_space<vmem>>, vector<1x8x128xf32>
    %62 = vector.shape_cast %61 : vector<1x8x128xf32> to vector<8x128xf32>
    %c0_51 = arith.constant 0 : index
    %c0_52 = arith.constant 0 : index
    %c0_53 = arith.constant 0 : index
    %63 = vector.load %arg3[%c0_51, %c0_52, %c0_53] : memref<2x128x128xf32, #tpu.memory_space<vmem>>, vector<1x128x128xf32>
    %64 = vector.shape_cast %63 : vector<1x128x128xf32> to vector<128x128xf32>
    %cst_54 = arith.constant dense<0.000000e+00> : vector<8x128xf32>
    %65 = tpu.matmul %62, %64, %cst_54 {dimension_numbers = #tpu.dot_dimension_numbers<[1], [0], [0], [1], [0, 0, 1, 1], [], []>} : vector<8x128xf32>, vector<128x128xf32>, vector<8x128xf32> -> vector<8x128xf32>
    %c0_55 = arith.constant 0 : index
    %c0_56 = arith.constant 0 : index
    %c0_57 = arith.constant 0 : index
    %66 = vector.load %arg4[%c0_55, %c0_56, %c0_57] : memref<2x128x128xf32, #tpu.memory_space<vmem>>, vector<1x128x128xf32>
    %67 = vector.shape_cast %66 : vector<1x128x128xf32> to vector<128x128xf32>
    %cst_58 = arith.constant dense<0.000000e+00> : vector<8x128xf32>
    %68 = tpu.matmul %47, %67, %cst_58 {dimension_numbers = #tpu.dot_dimension_numbers<[1], [0], [0], [1], [0, 0, 1, 1], [], []>} : vector<8x128xf32>, vector<128x128xf32>, vector<8x128xf32> -> vector<8x128xf32>
    %69 = arith.addf %65, %68 : vector<8x128xf32>
    %c0_59 = arith.constant 0 : index
    %c0_60 = arith.constant 0 : index
    %c0_61 = arith.constant 0 : index
    %70 = vector.load %arg6[%c0_59, %c0_60, %c0_61] : memref<2x1x128xf32, #tpu.memory_space<vmem>>, vector<1x1x128xf32>
    %71 = vector.shape_cast %70 : vector<1x1x128xf32> to vector<1x128xf32>
    %72 = vector.broadcast %71 : vector<1x128xf32> to vector<8x128xf32>
    %73 = arith.addf %69, %72 : vector<8x128xf32>
    %74 = math.tanh %73 : vector<8x128xf32>
    %c1_62 = arith.constant 1 : index
    %c0_63 = arith.constant 0 : index
    %c0_64 = arith.constant 0 : index
    %75 = vector.load %arg3[%c1_62, %c0_63, %c0_64] : memref<2x128x128xf32, #tpu.memory_space<vmem>>, vector<1x128x128xf32>
    %76 = vector.shape_cast %75 : vector<1x128x128xf32> to vector<128x128xf32>
    %cst_65 = arith.constant dense<0.000000e+00> : vector<8x128xf32>
    %77 = tpu.matmul %74, %76, %cst_65 {dimension_numbers = #tpu.dot_dimension_numbers<[1], [0], [0], [1], [0, 0, 1, 1], [], []>} : vector<8x128xf32>, vector<128x128xf32>, vector<8x128xf32> -> vector<8x128xf32>
    %c1_66 = arith.constant 1 : index
    %c0_67 = arith.constant 0 : index
    %c0_68 = arith.constant 0 : index
    %78 = vector.load %arg4[%c1_66, %c0_67, %c0_68] : memref<2x128x128xf32, #tpu.memory_space<vmem>>, vector<1x128x128xf32>
    %79 = vector.shape_cast %78 : vector<1x128x128xf32> to vector<128x128xf32>
    %cst_69 = arith.constant dense<0.000000e+00> : vector<8x128xf32>
    %80 = tpu.matmul %59, %79, %cst_69 {dimension_numbers = #tpu.dot_dimension_numbers<[1], [0], [0], [1], [0, 0, 1, 1], [], []>} : vector<8x128xf32>, vector<128x128xf32>, vector<8x128xf32> -> vector<8x128xf32>
    %81 = arith.addf %77, %80 : vector<8x128xf32>
    %c1_70 = arith.constant 1 : index
    %c0_71 = arith.constant 0 : index
    %c0_72 = arith.constant 0 : index
    %82 = vector.load %arg6[%c1_70, %c0_71, %c0_72] : memref<2x1x128xf32, #tpu.memory_space<vmem>>, vector<1x1x128xf32>
    %83 = vector.shape_cast %82 : vector<1x1x128xf32> to vector<1x128xf32>
    %84 = vector.broadcast %83 : vector<1x128xf32> to vector<8x128xf32>
    %85 = arith.addf %81, %84 : vector<8x128xf32>
    %86 = math.tanh %85 : vector<8x128xf32>
    %c3_i32 = arith.constant 3 : i32
    %87 = arith.index_cast %c3_i32 : i32 to index
    %c0_73 = arith.constant 0 : index
    %c0_74 = arith.constant 0 : index
    %88 = vector.load %arg2[%87, %c0_73, %c0_74] : memref<8x8x128xf32, #tpu.memory_space<vmem>>, vector<1x8x128xf32>
    %89 = vector.shape_cast %88 : vector<1x8x128xf32> to vector<8x128xf32>
    %c0_75 = arith.constant 0 : index
    %c0_76 = arith.constant 0 : index
    %c0_77 = arith.constant 0 : index
    %90 = vector.load %arg3[%c0_75, %c0_76, %c0_77] : memref<2x128x128xf32, #tpu.memory_space<vmem>>, vector<1x128x128xf32>
    %91 = vector.shape_cast %90 : vector<1x128x128xf32> to vector<128x128xf32>
    %cst_78 = arith.constant dense<0.000000e+00> : vector<8x128xf32>
    %92 = tpu.matmul %89, %91, %cst_78 {dimension_numbers = #tpu.dot_dimension_numbers<[1], [0], [0], [1], [0, 0, 1, 1], [], []>} : vector<8x128xf32>, vector<128x128xf32>, vector<8x128xf32> -> vector<8x128xf32>
    %c0_79 = arith.constant 0 : index
    %c0_80 = arith.constant 0 : index
    %c0_81 = arith.constant 0 : index
    %93 = vector.load %arg4[%c0_79, %c0_80, %c0_81] : memref<2x128x128xf32, #tpu.memory_space<vmem>>, vector<1x128x128xf32>
    %94 = vector.shape_cast %93 : vector<1x128x128xf32> to vector<128x128xf32>
    %cst_82 = arith.constant dense<0.000000e+00> : vector<8x128xf32>
    %95 = tpu.matmul %74, %94, %cst_82 {dimension_numbers = #tpu.dot_dimension_numbers<[1], [0], [0], [1], [0, 0, 1, 1], [], []>} : vector<8x128xf32>, vector<128x128xf32>, vector<8x128xf32> -> vector<8x128xf32>
    %96 = arith.addf %92, %95 : vector<8x128xf32>
    %c0_83 = arith.constant 0 : index
    %c0_84 = arith.constant 0 : index
    %c0_85 = arith.constant 0 : index
    %97 = vector.load %arg6[%c0_83, %c0_84, %c0_85] : memref<2x1x128xf32, #tpu.memory_space<vmem>>, vector<1x1x128xf32>
    %98 = vector.shape_cast %97 : vector<1x1x128xf32> to vector<1x128xf32>
    %99 = vector.broadcast %98 : vector<1x128xf32> to vector<8x128xf32>
    %100 = arith.addf %96, %99 : vector<8x128xf32>
    %101 = math.tanh %100 : vector<8x128xf32>
    %c1_86 = arith.constant 1 : index
    %c0_87 = arith.constant 0 : index
    %c0_88 = arith.constant 0 : index
    %102 = vector.load %arg3[%c1_86, %c0_87, %c0_88] : memref<2x128x128xf32, #tpu.memory_space<vmem>>, vector<1x128x128xf32>
    %103 = vector.shape_cast %102 : vector<1x128x128xf32> to vector<128x128xf32>
    %cst_89 = arith.constant dense<0.000000e+00> : vector<8x128xf32>
    %104 = tpu.matmul %101, %103, %cst_89 {dimension_numbers = #tpu.dot_dimension_numbers<[1], [0], [0], [1], [0, 0, 1, 1], [], []>} : vector<8x128xf32>, vector<128x128xf32>, vector<8x128xf32> -> vector<8x128xf32>
    %c1_90 = arith.constant 1 : index
    %c0_91 = arith.constant 0 : index
    %c0_92 = arith.constant 0 : index
    %105 = vector.load %arg4[%c1_90, %c0_91, %c0_92] : memref<2x128x128xf32, #tpu.memory_space<vmem>>, vector<1x128x128xf32>
    %106 = vector.shape_cast %105 : vector<1x128x128xf32> to vector<128x128xf32>
    %cst_93 = arith.constant dense<0.000000e+00> : vector<8x128xf32>
    %107 = tpu.matmul %86, %106, %cst_93 {dimension_numbers = #tpu.dot_dimension_numbers<[1], [0], [0], [1], [0, 0, 1, 1], [], []>} : vector<8x128xf32>, vector<128x128xf32>, vector<8x128xf32> -> vector<8x128xf32>
    %108 = arith.addf %104, %107 : vector<8x128xf32>
    %c1_94 = arith.constant 1 : index
    %c0_95 = arith.constant 0 : index
    %c0_96 = arith.constant 0 : index
    %109 = vector.load %arg6[%c1_94, %c0_95, %c0_96] : memref<2x1x128xf32, #tpu.memory_space<vmem>>, vector<1x1x128xf32>
    %110 = vector.shape_cast %109 : vector<1x1x128xf32> to vector<1x128xf32>
    %111 = vector.broadcast %110 : vector<1x128xf32> to vector<8x128xf32>
    %112 = arith.addf %108, %111 : vector<8x128xf32>
    %113 = math.tanh %112 : vector<8x128xf32>
    %c4_i32 = arith.constant 4 : i32
    %114 = arith.index_cast %c4_i32 : i32 to index
    %c0_97 = arith.constant 0 : index
    %c0_98 = arith.constant 0 : index
    %115 = vector.load %arg2[%114, %c0_97, %c0_98] : memref<8x8x128xf32, #tpu.memory_space<vmem>>, vector<1x8x128xf32>
    %116 = vector.shape_cast %115 : vector<1x8x128xf32> to vector<8x128xf32>
    %c0_99 = arith.constant 0 : index
    %c0_100 = arith.constant 0 : index
    %c0_101 = arith.constant 0 : index
    %117 = vector.load %arg3[%c0_99, %c0_100, %c0_101] : memref<2x128x128xf32, #tpu.memory_space<vmem>>, vector<1x128x128xf32>
    %118 = vector.shape_cast %117 : vector<1x128x128xf32> to vector<128x128xf32>
    %cst_102 = arith.constant dense<0.000000e+00> : vector<8x128xf32>
    %119 = tpu.matmul %116, %118, %cst_102 {dimension_numbers = #tpu.dot_dimension_numbers<[1], [0], [0], [1], [0, 0, 1, 1], [], []>} : vector<8x128xf32>, vector<128x128xf32>, vector<8x128xf32> -> vector<8x128xf32>
    %c0_103 = arith.constant 0 : index
    %c0_104 = arith.constant 0 : index
    %c0_105 = arith.constant 0 : index
    %120 = vector.load %arg4[%c0_103, %c0_104, %c0_105] : memref<2x128x128xf32, #tpu.memory_space<vmem>>, vector<1x128x128xf32>
    %121 = vector.shape_cast %120 : vector<1x128x128xf32> to vector<128x128xf32>
    %cst_106 = arith.constant dense<0.000000e+00> : vector<8x128xf32>
    %122 = tpu.matmul %101, %121, %cst_106 {dimension_numbers = #tpu.dot_dimension_numbers<[1], [0], [0], [1], [0, 0, 1, 1], [], []>} : vector<8x128xf32>, vector<128x128xf32>, vector<8x128xf32> -> vector<8x128xf32>
    %123 = arith.addf %119, %122 : vector<8x128xf32>
    %c0_107 = arith.constant 0 : index
    %c0_108 = arith.constant 0 : index
    %c0_109 = arith.constant 0 : index
    %124 = vector.load %arg6[%c0_107, %c0_108, %c0_109] : memref<2x1x128xf32, #tpu.memory_space<vmem>>, vector<1x1x128xf32>
    %125 = vector.shape_cast %124 : vector<1x1x128xf32> to vector<1x128xf32>
    %126 = vector.broadcast %125 : vector<1x128xf32> to vector<8x128xf32>
    %127 = arith.addf %123, %126 : vector<8x128xf32>
    %128 = math.tanh %127 : vector<8x128xf32>
    %c1_110 = arith.constant 1 : index
    %c0_111 = arith.constant 0 : index
    %c0_112 = arith.constant 0 : index
    %129 = vector.load %arg3[%c1_110, %c0_111, %c0_112] : memref<2x128x128xf32, #tpu.memory_space<vmem>>, vector<1x128x128xf32>
    %130 = vector.shape_cast %129 : vector<1x128x128xf32> to vector<128x128xf32>
    %cst_113 = arith.constant dense<0.000000e+00> : vector<8x128xf32>
    %131 = tpu.matmul %128, %130, %cst_113 {dimension_numbers = #tpu.dot_dimension_numbers<[1], [0], [0], [1], [0, 0, 1, 1], [], []>} : vector<8x128xf32>, vector<128x128xf32>, vector<8x128xf32> -> vector<8x128xf32>
    %c1_114 = arith.constant 1 : index
    %c0_115 = arith.constant 0 : index
    %c0_116 = arith.constant 0 : index
    %132 = vector.load %arg4[%c1_114, %c0_115, %c0_116] : memref<2x128x128xf32, #tpu.memory_space<vmem>>, vector<1x128x128xf32>
    %133 = vector.shape_cast %132 : vector<1x128x128xf32> to vector<128x128xf32>
    %cst_117 = arith.constant dense<0.000000e+00> : vector<8x128xf32>
    %134 = tpu.matmul %113, %133, %cst_117 {dimension_numbers = #tpu.dot_dimension_numbers<[1], [0], [0], [1], [0, 0, 1, 1], [], []>} : vector<8x128xf32>, vector<128x128xf32>, vector<8x128xf32> -> vector<8x128xf32>
    %135 = arith.addf %131, %134 : vector<8x128xf32>
    %c1_118 = arith.constant 1 : index
    %c0_119 = arith.constant 0 : index
    %c0_120 = arith.constant 0 : index
    %136 = vector.load %arg6[%c1_118, %c0_119, %c0_120] : memref<2x1x128xf32, #tpu.memory_space<vmem>>, vector<1x1x128xf32>
    %137 = vector.shape_cast %136 : vector<1x1x128xf32> to vector<1x128xf32>
    %138 = vector.broadcast %137 : vector<1x128xf32> to vector<8x128xf32>
    %139 = arith.addf %135, %138 : vector<8x128xf32>
    %140 = math.tanh %139 : vector<8x128xf32>
    %c5_i32 = arith.constant 5 : i32
    %141 = arith.index_cast %c5_i32 : i32 to index
    %c0_121 = arith.constant 0 : index
    %c0_122 = arith.constant 0 : index
    %142 = vector.load %arg2[%141, %c0_121, %c0_122] : memref<8x8x128xf32, #tpu.memory_space<vmem>>, vector<1x8x128xf32>
    %143 = vector.shape_cast %142 : vector<1x8x128xf32> to vector<8x128xf32>
    %c0_123 = arith.constant 0 : index
    %c0_124 = arith.constant 0 : index
    %c0_125 = arith.constant 0 : index
    %144 = vector.load %arg3[%c0_123, %c0_124, %c0_125] : memref<2x128x128xf32, #tpu.memory_space<vmem>>, vector<1x128x128xf32>
    %145 = vector.shape_cast %144 : vector<1x128x128xf32> to vector<128x128xf32>
    %cst_126 = arith.constant dense<0.000000e+00> : vector<8x128xf32>
    %146 = tpu.matmul %143, %145, %cst_126 {dimension_numbers = #tpu.dot_dimension_numbers<[1], [0], [0], [1], [0, 0, 1, 1], [], []>} : vector<8x128xf32>, vector<128x128xf32>, vector<8x128xf32> -> vector<8x128xf32>
    %c0_127 = arith.constant 0 : index
    %c0_128 = arith.constant 0 : index
    %c0_129 = arith.constant 0 : index
    %147 = vector.load %arg4[%c0_127, %c0_128, %c0_129] : memref<2x128x128xf32, #tpu.memory_space<vmem>>, vector<1x128x128xf32>
    %148 = vector.shape_cast %147 : vector<1x128x128xf32> to vector<128x128xf32>
    %cst_130 = arith.constant dense<0.000000e+00> : vector<8x128xf32>
    %149 = tpu.matmul %128, %148, %cst_130 {dimension_numbers = #tpu.dot_dimension_numbers<[1], [0], [0], [1], [0, 0, 1, 1], [], []>} : vector<8x128xf32>, vector<128x128xf32>, vector<8x128xf32> -> vector<8x128xf32>
    %150 = arith.addf %146, %149 : vector<8x128xf32>
    %c0_131 = arith.constant 0 : index
    %c0_132 = arith.constant 0 : index
    %c0_133 = arith.constant 0 : index
    %151 = vector.load %arg6[%c0_131, %c0_132, %c0_133] : memref<2x1x128xf32, #tpu.memory_space<vmem>>, vector<1x1x128xf32>
    %152 = vector.shape_cast %151 : vector<1x1x128xf32> to vector<1x128xf32>
    %153 = vector.broadcast %152 : vector<1x128xf32> to vector<8x128xf32>
    %154 = arith.addf %150, %153 : vector<8x128xf32>
    %155 = math.tanh %154 : vector<8x128xf32>
    %c1_134 = arith.constant 1 : index
    %c0_135 = arith.constant 0 : index
    %c0_136 = arith.constant 0 : index
    %156 = vector.load %arg3[%c1_134, %c0_135, %c0_136] : memref<2x128x128xf32, #tpu.memory_space<vmem>>, vector<1x128x128xf32>
    %157 = vector.shape_cast %156 : vector<1x128x128xf32> to vector<128x128xf32>
    %cst_137 = arith.constant dense<0.000000e+00> : vector<8x128xf32>
    %158 = tpu.matmul %155, %157, %cst_137 {dimension_numbers = #tpu.dot_dimension_numbers<[1], [0], [0], [1], [0, 0, 1, 1], [], []>} : vector<8x128xf32>, vector<128x128xf32>, vector<8x128xf32> -> vector<8x128xf32>
    %c1_138 = arith.constant 1 : index
    %c0_139 = arith.constant 0 : index
    %c0_140 = arith.constant 0 : index
    %159 = vector.load %arg4[%c1_138, %c0_139, %c0_140] : memref<2x128x128xf32, #tpu.memory_space<vmem>>, vector<1x128x128xf32>
    %160 = vector.shape_cast %159 : vector<1x128x128xf32> to vector<128x128xf32>
    %cst_141 = arith.constant dense<0.000000e+00> : vector<8x128xf32>
    %161 = tpu.matmul %140, %160, %cst_141 {dimension_numbers = #tpu.dot_dimension_numbers<[1], [0], [0], [1], [0, 0, 1, 1], [], []>} : vector<8x128xf32>, vector<128x128xf32>, vector<8x128xf32> -> vector<8x128xf32>
    %162 = arith.addf %158, %161 : vector<8x128xf32>
    %c1_142 = arith.constant 1 : index
    %c0_143 = arith.constant 0 : index
    %c0_144 = arith.constant 0 : index
    %163 = vector.load %arg6[%c1_142, %c0_143, %c0_144] : memref<2x1x128xf32, #tpu.memory_space<vmem>>, vector<1x1x128xf32>
    %164 = vector.shape_cast %163 : vector<1x1x128xf32> to vector<1x128xf32>
    %165 = vector.broadcast %164 : vector<1x128xf32> to vector<8x128xf32>
    %166 = arith.addf %162, %165 : vector<8x128xf32>
    %167 = math.tanh %166 : vector<8x128xf32>
    %c6_i32 = arith.constant 6 : i32
    %168 = arith.index_cast %c6_i32 : i32 to index
    %c0_145 = arith.constant 0 : index
    %c0_146 = arith.constant 0 : index
    %169 = vector.load %arg2[%168, %c0_145, %c0_146] : memref<8x8x128xf32, #tpu.memory_space<vmem>>, vector<1x8x128xf32>
    %170 = vector.shape_cast %169 : vector<1x8x128xf32> to vector<8x128xf32>
    %c0_147 = arith.constant 0 : index
    %c0_148 = arith.constant 0 : index
    %c0_149 = arith.constant 0 : index
    %171 = vector.load %arg3[%c0_147, %c0_148, %c0_149] : memref<2x128x128xf32, #tpu.memory_space<vmem>>, vector<1x128x128xf32>
    %172 = vector.shape_cast %171 : vector<1x128x128xf32> to vector<128x128xf32>
    %cst_150 = arith.constant dense<0.000000e+00> : vector<8x128xf32>
    %173 = tpu.matmul %170, %172, %cst_150 {dimension_numbers = #tpu.dot_dimension_numbers<[1], [0], [0], [1], [0, 0, 1, 1], [], []>} : vector<8x128xf32>, vector<128x128xf32>, vector<8x128xf32> -> vector<8x128xf32>
    %c0_151 = arith.constant 0 : index
    %c0_152 = arith.constant 0 : index
    %c0_153 = arith.constant 0 : index
    %174 = vector.load %arg4[%c0_151, %c0_152, %c0_153] : memref<2x128x128xf32, #tpu.memory_space<vmem>>, vector<1x128x128xf32>
    %175 = vector.shape_cast %174 : vector<1x128x128xf32> to vector<128x128xf32>
    %cst_154 = arith.constant dense<0.000000e+00> : vector<8x128xf32>
    %176 = tpu.matmul %155, %175, %cst_154 {dimension_numbers = #tpu.dot_dimension_numbers<[1], [0], [0], [1], [0, 0, 1, 1], [], []>} : vector<8x128xf32>, vector<128x128xf32>, vector<8x128xf32> -> vector<8x128xf32>
    %177 = arith.addf %173, %176 : vector<8x128xf32>
    %c0_155 = arith.constant 0 : index
    %c0_156 = arith.constant 0 : index
    %c0_157 = arith.constant 0 : index
    %178 = vector.load %arg6[%c0_155, %c0_156, %c0_157] : memref<2x1x128xf32, #tpu.memory_space<vmem>>, vector<1x1x128xf32>
    %179 = vector.shape_cast %178 : vector<1x1x128xf32> to vector<1x128xf32>
    %180 = vector.broadcast %179 : vector<1x128xf32> to vector<8x128xf32>
    %181 = arith.addf %177, %180 : vector<8x128xf32>
    %182 = math.tanh %181 : vector<8x128xf32>
    %c1_158 = arith.constant 1 : index
    %c0_159 = arith.constant 0 : index
    %c0_160 = arith.constant 0 : index
    %183 = vector.load %arg3[%c1_158, %c0_159, %c0_160] : memref<2x128x128xf32, #tpu.memory_space<vmem>>, vector<1x128x128xf32>
    %184 = vector.shape_cast %183 : vector<1x128x128xf32> to vector<128x128xf32>
    %cst_161 = arith.constant dense<0.000000e+00> : vector<8x128xf32>
    %185 = tpu.matmul %182, %184, %cst_161 {dimension_numbers = #tpu.dot_dimension_numbers<[1], [0], [0], [1], [0, 0, 1, 1], [], []>} : vector<8x128xf32>, vector<128x128xf32>, vector<8x128xf32> -> vector<8x128xf32>
    %c1_162 = arith.constant 1 : index
    %c0_163 = arith.constant 0 : index
    %c0_164 = arith.constant 0 : index
    %186 = vector.load %arg4[%c1_162, %c0_163, %c0_164] : memref<2x128x128xf32, #tpu.memory_space<vmem>>, vector<1x128x128xf32>
    %187 = vector.shape_cast %186 : vector<1x128x128xf32> to vector<128x128xf32>
    %cst_165 = arith.constant dense<0.000000e+00> : vector<8x128xf32>
    %188 = tpu.matmul %167, %187, %cst_165 {dimension_numbers = #tpu.dot_dimension_numbers<[1], [0], [0], [1], [0, 0, 1, 1], [], []>} : vector<8x128xf32>, vector<128x128xf32>, vector<8x128xf32> -> vector<8x128xf32>
    %189 = arith.addf %185, %188 : vector<8x128xf32>
    %c1_166 = arith.constant 1 : index
    %c0_167 = arith.constant 0 : index
    %c0_168 = arith.constant 0 : index
    %190 = vector.load %arg6[%c1_166, %c0_167, %c0_168] : memref<2x1x128xf32, #tpu.memory_space<vmem>>, vector<1x1x128xf32>
    %191 = vector.shape_cast %190 : vector<1x1x128xf32> to vector<1x128xf32>
    %192 = vector.broadcast %191 : vector<1x128xf32> to vector<8x128xf32>
    %193 = arith.addf %189, %192 : vector<8x128xf32>
    %194 = math.tanh %193 : vector<8x128xf32>
    %c7_i32 = arith.constant 7 : i32
    %195 = arith.index_cast %c7_i32 : i32 to index
    %c0_169 = arith.constant 0 : index
    %c0_170 = arith.constant 0 : index
    %196 = vector.load %arg2[%195, %c0_169, %c0_170] : memref<8x8x128xf32, #tpu.memory_space<vmem>>, vector<1x8x128xf32>
    %197 = vector.shape_cast %196 : vector<1x8x128xf32> to vector<8x128xf32>
    %c0_171 = arith.constant 0 : index
    %c0_172 = arith.constant 0 : index
    %c0_173 = arith.constant 0 : index
    %198 = vector.load %arg3[%c0_171, %c0_172, %c0_173] : memref<2x128x128xf32, #tpu.memory_space<vmem>>, vector<1x128x128xf32>
    %199 = vector.shape_cast %198 : vector<1x128x128xf32> to vector<128x128xf32>
    %cst_174 = arith.constant dense<0.000000e+00> : vector<8x128xf32>
    %200 = tpu.matmul %197, %199, %cst_174 {dimension_numbers = #tpu.dot_dimension_numbers<[1], [0], [0], [1], [0, 0, 1, 1], [], []>} : vector<8x128xf32>, vector<128x128xf32>, vector<8x128xf32> -> vector<8x128xf32>
    %c0_175 = arith.constant 0 : index
    %c0_176 = arith.constant 0 : index
    %c0_177 = arith.constant 0 : index
    %201 = vector.load %arg4[%c0_175, %c0_176, %c0_177] : memref<2x128x128xf32, #tpu.memory_space<vmem>>, vector<1x128x128xf32>
    %202 = vector.shape_cast %201 : vector<1x128x128xf32> to vector<128x128xf32>
    %cst_178 = arith.constant dense<0.000000e+00> : vector<8x128xf32>
    %203 = tpu.matmul %182, %202, %cst_178 {dimension_numbers = #tpu.dot_dimension_numbers<[1], [0], [0], [1], [0, 0, 1, 1], [], []>} : vector<8x128xf32>, vector<128x128xf32>, vector<8x128xf32> -> vector<8x128xf32>
    %204 = arith.addf %200, %203 : vector<8x128xf32>
    %c0_179 = arith.constant 0 : index
    %c0_180 = arith.constant 0 : index
    %c0_181 = arith.constant 0 : index
    %205 = vector.load %arg6[%c0_179, %c0_180, %c0_181] : memref<2x1x128xf32, #tpu.memory_space<vmem>>, vector<1x1x128xf32>
    %206 = vector.shape_cast %205 : vector<1x1x128xf32> to vector<1x128xf32>
    %207 = vector.broadcast %206 : vector<1x128xf32> to vector<8x128xf32>
    %208 = arith.addf %204, %207 : vector<8x128xf32>
    %209 = math.tanh %208 : vector<8x128xf32>
    %c1_182 = arith.constant 1 : index
    %c0_183 = arith.constant 0 : index
    %c0_184 = arith.constant 0 : index
    %210 = vector.load %arg3[%c1_182, %c0_183, %c0_184] : memref<2x128x128xf32, #tpu.memory_space<vmem>>, vector<1x128x128xf32>
    %211 = vector.shape_cast %210 : vector<1x128x128xf32> to vector<128x128xf32>
    %cst_185 = arith.constant dense<0.000000e+00> : vector<8x128xf32>
    %212 = tpu.matmul %209, %211, %cst_185 {dimension_numbers = #tpu.dot_dimension_numbers<[1], [0], [0], [1], [0, 0, 1, 1], [], []>} : vector<8x128xf32>, vector<128x128xf32>, vector<8x128xf32> -> vector<8x128xf32>
    %c1_186 = arith.constant 1 : index
    %c0_187 = arith.constant 0 : index
    %c0_188 = arith.constant 0 : index
    %213 = vector.load %arg4[%c1_186, %c0_187, %c0_188] : memref<2x128x128xf32, #tpu.memory_space<vmem>>, vector<1x128x128xf32>
    %214 = vector.shape_cast %213 : vector<1x128x128xf32> to vector<128x128xf32>
    %cst_189 = arith.constant dense<0.000000e+00> : vector<8x128xf32>
    %215 = tpu.matmul %194, %214, %cst_189 {dimension_numbers = #tpu.dot_dimension_numbers<[1], [0], [0], [1], [0, 0, 1, 1], [], []>} : vector<8x128xf32>, vector<128x128xf32>, vector<8x128xf32> -> vector<8x128xf32>
    %216 = arith.addf %212, %215 : vector<8x128xf32>
    %c1_190 = arith.constant 1 : index
    %c0_191 = arith.constant 0 : index
    %c0_192 = arith.constant 0 : index
    %217 = vector.load %arg6[%c1_190, %c0_191, %c0_192] : memref<2x1x128xf32, #tpu.memory_space<vmem>>, vector<1x1x128xf32>
    %218 = vector.shape_cast %217 : vector<1x1x128xf32> to vector<1x128xf32>
    %219 = vector.broadcast %218 : vector<1x128xf32> to vector<8x128xf32>
    %220 = arith.addf %216, %219 : vector<8x128xf32>
    %221 = math.tanh %220 : vector<8x128xf32>
    %c8_i32 = arith.constant 8 : i32
    %c0_193 = arith.constant 0 : index
    %c0_194 = arith.constant 0 : index
    %222 = vector.load %arg7[%c0_193, %c0_194] : memref<1x128xf32, #tpu.memory_space<vmem>>, vector<1x128xf32>
    %223 = vector.broadcast %222 : vector<1x128xf32> to vector<8x128xf32>
    %224 = arith.mulf %221, %223 : vector<8x128xf32>
    %cst_195 = arith.constant dense<0.000000e+00> : vector<8xf32>
    %225 = vector.multi_reduction <add>, %224, %cst_195 [1] : vector<8x128xf32> to vector<8xf32>
    %226 = vector.shape_cast %225 : vector<8xf32> to vector<8x1xf32>
    %227 = vector.broadcast %2 : f32 to vector<8x1xf32>
    %228 = arith.addf %226, %227 : vector<8x1xf32>
    %229 = arith.mulf %221, %221 : vector<8x128xf32>
    %cst_196 = arith.constant 1.000000e+00 : f32
    %230 = vector.broadcast %cst_196 : f32 to vector<8x128xf32>
    %231 = arith.subf %230, %229 : vector<8x128xf32>
    %232 = vector.broadcast %222 : vector<1x128xf32> to vector<8x128xf32>
    %233 = arith.mulf %232, %231 : vector<8x128xf32>
    %c1_197 = arith.constant 1 : index
    %c0_198 = arith.constant 0 : index
    %c0_199 = arith.constant 0 : index
    %234 = vector.load %arg5[%c1_197, %c0_198, %c0_199] : memref<2x128x128xf32, #tpu.memory_space<vmem>>, vector<1x128x128xf32>
    %235 = vector.shape_cast %234 : vector<1x128x128xf32> to vector<128x128xf32>
    %cst_200 = arith.constant dense<0.000000e+00> : vector<8x128xf32>
    %236 = tpu.matmul %233, %235, %cst_200 {dimension_numbers = #tpu.dot_dimension_numbers<[1], [0], [0], [1], [0, 0, 1, 1], [], []>} : vector<8x128xf32>, vector<128x128xf32>, vector<8x128xf32> -> vector<8x128xf32>
    %237 = arith.mulf %209, %209 : vector<8x128xf32>
    %cst_201 = arith.constant 1.000000e+00 : f32
    %238 = vector.broadcast %cst_201 : f32 to vector<8x128xf32>
    %239 = arith.subf %238, %237 : vector<8x128xf32>
    %240 = arith.mulf %236, %239 : vector<8x128xf32>
    %c0_202 = arith.constant 0 : index
    %c0_203 = arith.constant 0 : index
    %c0_204 = arith.constant 0 : index
    %241 = vector.load %arg5[%c0_202, %c0_203, %c0_204] : memref<2x128x128xf32, #tpu.memory_space<vmem>>, vector<1x128x128xf32>
    %242 = vector.shape_cast %241 : vector<1x128x128xf32> to vector<128x128xf32>
    %cst_205 = arith.constant dense<0.000000e+00> : vector<8x128xf32>
    %243 = tpu.matmul %240, %242, %cst_205 {dimension_numbers = #tpu.dot_dimension_numbers<[1], [0], [0], [1], [0, 0, 1, 1], [], []>} : vector<8x128xf32>, vector<128x128xf32>, vector<8x128xf32> -> vector<8x128xf32>
    %244 = vector.extract_strided_slice %243 {offsets = [0, 3], sizes = [8, 1], strides = [1, 1]} : vector<8x128xf32> to vector<8x1xf32>
    %c0_206 = arith.constant 0 : index
    %c0_207 = arith.constant 0 : index
    %245 = vector.load %arg8[%c0_206, %c0_207] : memref<1x128xf32, #tpu.memory_space<vmem>>, vector<1x128xf32>
    %246 = vector.broadcast %228 : vector<8x1xf32> to vector<8x128xf32>
    %247 = vector.broadcast %245 : vector<1x128xf32> to vector<8x128xf32>
    %248 = arith.mulf %246, %247 : vector<8x128xf32>
    %c0_208 = arith.constant 0 : index
    %c0_209 = arith.constant 0 : index
    %249 = vector.load %arg9[%c0_208, %c0_209] : memref<1x128xf32, #tpu.memory_space<vmem>>, vector<1x128xf32>
    %250 = vector.broadcast %249 : vector<1x128xf32> to vector<8x128xf32>
    %251 = arith.addf %248, %250 : vector<8x128xf32>
    %c0_210 = arith.constant 0 : index
    %c0_211 = arith.constant 0 : index
    %252 = vector.load %arg10[%c0_210, %c0_211] : memref<1x128xf32, #tpu.memory_space<vmem>>, vector<1x128xf32>
    %253 = vector.broadcast %252 : vector<1x128xf32> to vector<8x128xf32>
    %254 = arith.mulf %251, %253 : vector<8x128xf32>
    %cst_212 = arith.constant dense<0.000000e+00> : vector<8xf32>
    %255 = vector.multi_reduction <add>, %254, %cst_212 [1] : vector<8x128xf32> to vector<8xf32>
    %256 = vector.shape_cast %255 : vector<8xf32> to vector<8x1xf32>
    %257 = vector.broadcast %3 : f32 to vector<8x1xf32>
    %258 = arith.addf %256, %257 : vector<8x1xf32>
    %c7 = arith.constant 7 : index
    %c0_213 = arith.constant 0 : index
    %c0_214 = arith.constant 0 : index
    %259 = vector.load %arg2[%c7, %c0_213, %c0_214] : memref<8x8x128xf32, #tpu.memory_space<vmem>>, vector<1x8x128xf32>
    %260 = vector.shape_cast %259 : vector<1x8x128xf32> to vector<8x128xf32>
    %261 = vector.extract_strided_slice %260 {offsets = [0, 0], sizes = [8, 1], strides = [1, 1]} : vector<8x128xf32> to vector<8x1xf32>
    %c7_215 = arith.constant 7 : index
    %c0_216 = arith.constant 0 : index
    %c0_217 = arith.constant 0 : index
    %262 = vector.load %arg2[%c7_215, %c0_216, %c0_217] : memref<8x8x128xf32, #tpu.memory_space<vmem>>, vector<1x8x128xf32>
    %263 = vector.shape_cast %262 : vector<1x8x128xf32> to vector<8x128xf32>
    %264 = vector.extract_strided_slice %263 {offsets = [0, 1], sizes = [8, 1], strides = [1, 1]} : vector<8x128xf32> to vector<8x1xf32>
    %c0_218 = arith.constant 0 : index
    %c0_219 = arith.constant 0 : index
    %c0_220 = arith.constant 0 : index
    %265 = vector.load %arg2[%c0_218, %c0_219, %c0_220] : memref<8x8x128xf32, #tpu.memory_space<vmem>>, vector<1x8x128xf32>
    %266 = vector.shape_cast %265 : vector<1x8x128xf32> to vector<8x128xf32>
    %267 = vector.extract_strided_slice %266 {offsets = [0, 0], sizes = [8, 1], strides = [1, 1]} : vector<8x128xf32> to vector<8x1xf32>
    %c1_221 = arith.constant 1 : index
    %c0_222 = arith.constant 0 : index
    %c0_223 = arith.constant 0 : index
    %268 = vector.load %arg2[%c1_221, %c0_222, %c0_223] : memref<8x8x128xf32, #tpu.memory_space<vmem>>, vector<1x8x128xf32>
    %269 = vector.shape_cast %268 : vector<1x8x128xf32> to vector<8x128xf32>
    %270 = vector.extract_strided_slice %269 {offsets = [0, 0], sizes = [8, 1], strides = [1, 1]} : vector<8x128xf32> to vector<8x1xf32>
    %c2_224 = arith.constant 2 : index
    %c0_225 = arith.constant 0 : index
    %c0_226 = arith.constant 0 : index
    %271 = vector.load %arg2[%c2_224, %c0_225, %c0_226] : memref<8x8x128xf32, #tpu.memory_space<vmem>>, vector<1x8x128xf32>
    %272 = vector.shape_cast %271 : vector<1x8x128xf32> to vector<8x128xf32>
    %273 = vector.extract_strided_slice %272 {offsets = [0, 0], sizes = [8, 1], strides = [1, 1]} : vector<8x128xf32> to vector<8x1xf32>
    %c3_227 = arith.constant 3 : index
    %c0_228 = arith.constant 0 : index
    %c0_229 = arith.constant 0 : index
    %274 = vector.load %arg2[%c3_227, %c0_228, %c0_229] : memref<8x8x128xf32, #tpu.memory_space<vmem>>, vector<1x8x128xf32>
    %275 = vector.shape_cast %274 : vector<1x8x128xf32> to vector<8x128xf32>
    %276 = vector.extract_strided_slice %275 {offsets = [0, 0], sizes = [8, 1], strides = [1, 1]} : vector<8x128xf32> to vector<8x1xf32>
    %c4 = arith.constant 4 : index
    %c0_230 = arith.constant 0 : index
    %c0_231 = arith.constant 0 : index
    %277 = vector.load %arg2[%c4, %c0_230, %c0_231] : memref<8x8x128xf32, #tpu.memory_space<vmem>>, vector<1x8x128xf32>
    %278 = vector.shape_cast %277 : vector<1x8x128xf32> to vector<8x128xf32>
    %279 = vector.extract_strided_slice %278 {offsets = [0, 0], sizes = [8, 1], strides = [1, 1]} : vector<8x128xf32> to vector<8x1xf32>
    %c5 = arith.constant 5 : index
    %c0_232 = arith.constant 0 : index
    %c0_233 = arith.constant 0 : index
    %280 = vector.load %arg2[%c5, %c0_232, %c0_233] : memref<8x8x128xf32, #tpu.memory_space<vmem>>, vector<1x8x128xf32>
    %281 = vector.shape_cast %280 : vector<1x8x128xf32> to vector<8x128xf32>
    %282 = vector.extract_strided_slice %281 {offsets = [0, 0], sizes = [8, 1], strides = [1, 1]} : vector<8x128xf32> to vector<8x1xf32>
    %c6 = arith.constant 6 : index
    %c0_234 = arith.constant 0 : index
    %c0_235 = arith.constant 0 : index
    %283 = vector.load %arg2[%c6, %c0_234, %c0_235] : memref<8x8x128xf32, #tpu.memory_space<vmem>>, vector<1x8x128xf32>
    %284 = vector.shape_cast %283 : vector<1x8x128xf32> to vector<8x128xf32>
    %285 = vector.extract_strided_slice %284 {offsets = [0, 0], sizes = [8, 1], strides = [1, 1]} : vector<8x128xf32> to vector<8x1xf32>
    %c7_236 = arith.constant 7 : index
    %c0_237 = arith.constant 0 : index
    %c0_238 = arith.constant 0 : index
    %286 = vector.load %arg2[%c7_236, %c0_237, %c0_238] : memref<8x8x128xf32, #tpu.memory_space<vmem>>, vector<1x8x128xf32>
    %287 = vector.shape_cast %286 : vector<1x8x128xf32> to vector<8x128xf32>
    %288 = vector.extract_strided_slice %287 {offsets = [0, 0], sizes = [8, 1], strides = [1, 1]} : vector<8x128xf32> to vector<8x1xf32>
    %289 = tpu.concatenate %267, %270, %273, %276, %279, %282, %285, %288 in 1 : vector<8x1xf32>, vector<8x1xf32>, vector<8x1xf32>, vector<8x1xf32>, vector<8x1xf32>, vector<8x1xf32>, vector<8x1xf32>, vector<8x1xf32> -> vector<8x8xf32>
    %c0_239 = arith.constant 0 : index
    %c0_240 = arith.constant 0 : index
    %290 = vector.load %arg11[%c0_239, %c0_240] : memref<1x8xf32, #tpu.memory_space<vmem>>, vector<1x8xf32>
    %291 = vector.broadcast %290 : vector<1x8xf32> to vector<8x8xf32>
    %292 = arith.mulf %289, %291 : vector<8x8xf32>
    %cst_241 = arith.constant dense<0.000000e+00> : vector<8xf32>
    %293 = vector.multi_reduction <add>, %292, %cst_241 [1] : vector<8x8xf32> to vector<8xf32>
    %294 = vector.shape_cast %293 : vector<8xf32> to vector<8x1xf32>
    %c7_242 = arith.constant 7 : index
    %c0_243 = arith.constant 0 : index
    %c0_244 = arith.constant 0 : index
    %295 = vector.load %arg2[%c7_242, %c0_243, %c0_244] : memref<8x8x128xf32, #tpu.memory_space<vmem>>, vector<1x8x128xf32>
    %296 = vector.shape_cast %295 : vector<1x8x128xf32> to vector<8x128xf32>
    %297 = vector.extract_strided_slice %296 {offsets = [0, 3], sizes = [8, 1], strides = [1, 1]} : vector<8x128xf32> to vector<8x1xf32>
    %c0_245 = arith.constant 0 : index
    %c0_246 = arith.constant 0 : index
    %c0_247 = arith.constant 0 : index
    %298 = vector.load %arg2[%c0_245, %c0_246, %c0_247] : memref<8x8x128xf32, #tpu.memory_space<vmem>>, vector<1x8x128xf32>
    %299 = vector.shape_cast %298 : vector<1x8x128xf32> to vector<8x128xf32>
    %300 = vector.extract_strided_slice %299 {offsets = [0, 3], sizes = [8, 1], strides = [1, 1]} : vector<8x128xf32> to vector<8x1xf32>
    %301 = arith.subf %297, %300 : vector<8x1xf32>
    %cst_248 = arith.constant 7.000000e+00 : f32
    %302 = vector.broadcast %cst_248 : f32 to vector<8x1xf32>
    %303 = arith.divf %301, %302 : vector<8x1xf32>
    %304 = math.sqrt %303 : vector<8x1xf32>
    %cst_249 = arith.constant 0.000000e+00 : f32
    %305 = vector.broadcast %cst_249 : f32 to vector<8x1xf32>
    %306 = arith.subf %305, %304 : vector<8x1xf32>
    %307 = arith.mulf %0, %1 : f32
    %308 = vector.broadcast %307 : f32 to vector<8x1xf32>
    %309 = arith.divf %306, %308 : vector<8x1xf32>
    %310 = vector.broadcast %1 : f32 to vector<8x1xf32>
    %311 = arith.divf %304, %310 : vector<8x1xf32>
    %312 = arith.mulf %311, %264 : vector<8x1xf32>
    %313 = arith.mulf %309, %261 : vector<8x1xf32>
    %314 = arith.addf %313, %312 : vector<8x1xf32>
    %315 = arith.subf %314, %294 : vector<8x1xf32>
    %cst_250 = arith.constant 0.000000e+00 : f32
    %316 = vector.broadcast %cst_250 : f32 to vector<8x124xf32>
    %317 = tpu.concatenate %228, %244, %258, %315, %316 in 1 : vector<8x1xf32>, vector<8x1xf32>, vector<8x1xf32>, vector<8x1xf32>, vector<8x124xf32> -> vector<8x128xf32>
    %c0_251 = arith.constant 0 : index
    %c0_252 = arith.constant 0 : index
    %318 = vector.load %arg12[%c0_251, %c0_252] : memref<8x128xf32, #tpu.memory_space<vmem>>, vector<8x128xf32>
    tpu.vector_store %arg12[%c0_251, %c0_252], %317 {strides = array<i32>} : memref<8x128xf32, #tpu.memory_space<vmem>>, vector<8x128xf32>,
    return
  }
  func.func @transform_0(%arg0: i32) -> i32 {
    %c0_i32 = arith.constant 0 : i32
    %c0_i32_0 = arith.constant 0 : i32
    return %c0_i32 : i32
  }
  func.func @transform_1(%arg0: i32) -> (i32, i32, i32) {
    %c0_i32 = arith.constant 0 : i32
    %c0_i32_0 = arith.constant 0 : i32
    %c0_i32_1 = arith.constant 0 : i32
    return %c0_i32, %arg0, %c0_i32_0 : i32, i32, i32
  }
  func.func @transform_2(%arg0: i32) -> (i32, i32, i32) {
    %c0_i32 = arith.constant 0 : i32
    %c0_i32_0 = arith.constant 0 : i32
    %c0_i32_1 = arith.constant 0 : i32
    %c0_i32_2 = arith.constant 0 : i32
    return %c0_i32, %c0_i32_0, %c0_i32_1 : i32, i32, i32
  }
  func.func @transform_3(%arg0: i32) -> (i32, i32, i32) {
    %c0_i32 = arith.constant 0 : i32
    %c0_i32_0 = arith.constant 0 : i32
    %c0_i32_1 = arith.constant 0 : i32
    %c0_i32_2 = arith.constant 0 : i32
    return %c0_i32, %c0_i32_0, %c0_i32_1 : i32, i32, i32
  }
  func.func @transform_4(%arg0: i32) -> (i32, i32, i32) {
    %c0_i32 = arith.constant 0 : i32
    %c0_i32_0 = arith.constant 0 : i32
    %c0_i32_1 = arith.constant 0 : i32
    %c0_i32_2 = arith.constant 0 : i32
    return %c0_i32, %c0_i32_0, %c0_i32_1 : i32, i32, i32
  }
  func.func @transform_5(%arg0: i32) -> (i32, i32, i32) {
    %c0_i32 = arith.constant 0 : i32
    %c0_i32_0 = arith.constant 0 : i32
    %c0_i32_1 = arith.constant 0 : i32
    %c0_i32_2 = arith.constant 0 : i32
    return %c0_i32, %c0_i32_0, %c0_i32_1 : i32, i32, i32
  }
  func.func @transform_6(%arg0: i32) -> (i32, i32) {
    %c0_i32 = arith.constant 0 : i32
    %c0_i32_0 = arith.constant 0 : i32
    %c0_i32_1 = arith.constant 0 : i32
    return %c0_i32, %c0_i32_0 : i32, i32
  }
  func.func @transform_7(%arg0: i32) -> (i32, i32) {
    %c0_i32 = arith.constant 0 : i32
    %c0_i32_0 = arith.constant 0 : i32
    %c0_i32_1 = arith.constant 0 : i32
    return %c0_i32, %c0_i32_0 : i32, i32
  }
  func.func @transform_8(%arg0: i32) -> (i32, i32) {
    %c0_i32 = arith.constant 0 : i32
    %c0_i32_0 = arith.constant 0 : i32
    %c0_i32_1 = arith.constant 0 : i32
    return %c0_i32, %c0_i32_0 : i32, i32
  }
  func.func @transform_9(%arg0: i32) -> (i32, i32) {
    %c0_i32 = arith.constant 0 : i32
    %c0_i32_0 = arith.constant 0 : i32
    %c0_i32_1 = arith.constant 0 : i32
    return %c0_i32, %c0_i32_0 : i32, i32
  }
  func.func @transform_10(%arg0: i32) -> (i32, i32) {
    %c0_i32 = arith.constant 0 : i32
    %c0_i32_0 = arith.constant 0 : i32
    %c0_i32_1 = arith.constant 0 : i32
    return %c0_i32, %c0_i32_0 : i32, i32
  }
  func.func @transform_11(%arg0: i32) -> (i32, i32) {
    %c0_i32 = arith.constant 0 : i32
    %c0_i32_0 = arith.constant 0 : i32
    return %arg0, %c0_i32 : i32, i32
  }
}

</mosaic_0001>

<bundles_post_ra>
// kernel: tpu_custom_call.1
= control target key start
LH: loop header
LB: loop body
LE: loop exit
PB: predicated region body
PF: predicated region fallthrough
CT: control target
= control target key end

     0   :  { %16 = vsyncpa [#allocation5], 0  ;;  %s6510_s0 = inlined_call_operand.hbm [shape: f32[4], index: 0, kind: input, shape index: {}]   ;;  %s6511_s1 = inlined_call_operand.hbm [shape: f32[8,8,128], index: 1, kind: input, shape index: {}]   ;;  %s6512_s2 = inlined_call_operand.hbm [shape: f32[2,128,128], index: 2, kind: input, shape index: {}]   ;;  %s6513_s3 = inlined_call_operand.hbm [shape: f32[2,128,128], index: 3, kind: input, shape index: {}]   ;;  %s6514_s4 = inlined_call_operand.hbm [shape: f32[2,128,128], index: 4, kind: input, shape index: {}]   ;;  %s6515_s5 = inlined_call_operand.vmem [shape: f32[2,1,128], index: 5, kind: input, shape index: {}]   ;;  %s6516_s6 = inlined_call_operand.vmem [shape: f32[1,128], index: 6, kind: input, shape index: {}]   ;;  %s6517_s7 = inlined_call_operand.vmem [shape: f32[1,128], index: 7, kind: input, shape index: {}]   ;;  %s6518_s8 = inlined_call_operand.vmem [shape: f32[1,128], index: 8, kind: input, shape index: {}]   ;;  %s6519_s9 = inlined_call_operand.vmem [shape: f32[1,128], index: 9, kind: input, shape index: {}]   ;;  %s6520_s10 = inlined_call_operand.vmem [shape: f32[1,8], index: 10, kind: input, shape index: {}]   ;;  %s6521_s11 = inlined_call_operand.hbm [shape: f32[8,128], index: 11, kind: output, shape index: {}]  }
   0x1   :  { %17 = vsyncpa [#allocation3], 0 }
   0x2   :  { %18 = vsyncpa [#allocation8], 0 }
   0x3   :  { %19 = vsyncpa [#allocation11], 0 }
   0x4   :  { %20 = vsyncpa [#allocation4], 0  ;;  %s5592_s17 = smov [#allocation7]   ;;  %s5593_s19 = smov [#allocation6]  }
   0x5   :  { %s46_s18 = sshll.u32 %s5592_s17, 4  ;;  %s34_s20 = sshll.u32 %s5593_s19, 4  ;;  %s47_s18 = int_to_ptr.vmem [resolvable:$true] %s46_s18  ;;  %s35_s20 = int_to_ptr.vmem [resolvable:$true] %s34_s20 }
   0x6   :  { %s5462_s23 = scalar_lea.hbm %s6512_s2, 4096 }
   0x7   :  { %p5463_p0 = scmp.ne.s32.totalorder %s6512_s2, %s5462_s23  ;;  %p5466_p1 = scmp.lt.u32.totalorder %s5462_s23, %s6512_s2 }
   0x9   :  { %p5468_p2 = pnand %p5466_p1, %p5463_p0 }
   0xb   :  { %5471 = shalt.err (!%p5468_p2)
}
   0xc   :  { %s5472_s28 = scalar_lea.vmem %s47_s18, 4096  ;;  %p5477_p4 = scmp.lt.s32.totalorder %s47_s18, %s47_s18 }
   0xd   :  { %p5473_p3 = scmp.ne.s32.totalorder %s47_s18, %s5472_s28  ;;  %p5478_p5 = scmp.lt.s32.totalorder %s5472_s28, %s5472_s28 }
   0xf   :  { %p5479_p6 = por %p5478_p5, %p5477_p4 }
  0x11   :  { %p5480_p7 = pnand %p5479_p6, %p5473_p3 }
  0x13   :  { %5483 = shalt.err (!%p5480_p7)
}
  0x14   :  { %s5594_s29 = smov 128   ;;  %s5595_s30 = smov 8  }
  0x15   :  { %52 = dma.hbm_to_vmem [thread:$0]  %s6512_s2, 4096, %s47_s18, [#allocation8], %s5594_s29, %s5594_s29, %s5595_s30  }
  0x16   :  { %s5484_s16 = scalar_lea.hbm %s6510_s0, 16 }
  0x17   :  { %p5485_p8 = scmp.ne.s32.totalorder %s6510_s0, %s5484_s16  ;;  %p5488_p9 = scmp.lt.u32.totalorder %s5484_s16, %s6510_s0 }
  0x19   :  { %p5490_p10 = pnand %p5488_p9, %p5485_p8 }
  0x1b   :  { %5493 = shalt.err (!%p5490_p10)
}
  0x1c   :  { %s5596_s23 = smov [#allocation2]   ;;  %s5494_s26 = scalar_lea.hbm %s6511_s1, 1024 }
  0x1d   :  { %28 = dma.hbm_to_smem %s6510_s0, 16, %s5596_s23, [#allocation5]  }
  0x1e   :  { %p5495_p11 = scmp.ne.s32.totalorder %s6511_s1, %s5494_s26  ;;  %p5498_p12 = scmp.lt.u32.totalorder %s5494_s26, %s6511_s1 }
  0x20   :  { %p5500_p13 = pnand %p5498_p12, %p5495_p11 }
  0x22   :  { %5503 = shalt.err (!%p5500_p13)
}
  0x23   :  { %s5504_s14 = scalar_lea.vmem %s35_s20, 1024  ;;  %p5509_p1 = scmp.lt.s32.totalorder %s35_s20, %s35_s20 }
  0x24   :  { %p5505_p0 = scmp.ne.s32.totalorder %s35_s20, %s5504_s14  ;;  %p5510_p2 = scmp.lt.s32.totalorder %s5504_s14, %s5504_s14 }
  0x26   :  { %p5511_p3 = por %p5510_p2, %p5509_p1 }
  0x28   :  { %p5512_p4 = pnand %p5511_p3, %p5505_p0 }
  0x2a   :  { %5515 = shalt.err (!%p5512_p4)
}
  0x2b   :  { %40 = dma.hbm_to_vmem [thread:$0]  %s6511_s1, 1024, %s35_s20, [#allocation3], %s5594_s29, %s5594_s29, %s5595_s30  }
  0x2c   :  { %s5597_s16 = smov [#allocation9]   ;;  %s5598_s19 = smov [#allocation10]  }
  0x2d   :  { %s58_s17 = sshll.u32 %s5597_s16, 4  ;;  %s70_s21 = sshll.u32 %s5598_s19, 4  ;;  %s59_s17 = int_to_ptr.vmem [resolvable:$true] %s58_s17  ;;  %s71_s21 = int_to_ptr.vmem [resolvable:$true] %s70_s21 }
  0x2e   :  { %s5516_s24 = scalar_lea.hbm %s6513_s3, 4096 }
  0x2f   :  { %p5517_p5 = scmp.ne.s32.totalorder %s6513_s3, %s5516_s24  ;;  %p5520_p6 = scmp.lt.u32.totalorder %s5516_s24, %s6513_s3 }
  0x31   :  { %p5522_p7 = pnand %p5520_p6, %p5517_p5 }
  0x33   :  { %5525 = shalt.err (!%p5522_p7)
}
  0x34   :  { %s5526_s1 = scalar_lea.vmem %s59_s17, 4096  ;;  %p5531_p9 = scmp.lt.s32.totalorder %s59_s17, %s59_s17 }
  0x35   :  { %p5527_p8 = scmp.ne.s32.totalorder %s59_s17, %s5526_s1  ;;  %p5532_p10 = scmp.lt.s32.totalorder %s5526_s1, %s5526_s1 }
  0x37   :  { %p5533_p11 = por %p5532_p10, %p5531_p9 }
  0x39   :  { %p5534_p12 = pnand %p5533_p11, %p5527_p8 }
  0x3b   :  { %5537 = shalt.err (!%p5534_p12)
}
  0x3c   :  { %64 = dma.hbm_to_vmem [thread:$0]  %s6513_s3, 4096, %s59_s17, [#allocation8], %s5594_s29, %s5594_s29, %s5595_s30  }
  0x3d   :  { %s5538_s13 = scalar_lea.hbm %s6514_s4, 4096 }
  0x3e   :  { %p5539_p13 = scmp.ne.s32.totalorder %s6514_s4, %s5538_s13  ;;  %p5542_p0 = scmp.lt.u32.totalorder %s5538_s13, %s6514_s4 }
  0x40   :  { %p5544_p1 = pnand %p5542_p0, %p5539_p13 }
  0x42   :  { %5547 = shalt.err (!%p5544_p1)
}
  0x43   :  { %s5548_s19 = scalar_lea.vmem %s71_s21, 4096  ;;  %p5553_p3 = scmp.lt.s32.totalorder %s71_s21, %s71_s21 }
  0x44   :  { %p5549_p2 = scmp.ne.s32.totalorder %s71_s21, %s5548_s19  ;;  %p5554_p4 = scmp.lt.s32.totalorder %s5548_s19, %s5548_s19 }
  0x46   :  { %p5555_p5 = por %p5554_p4, %p5553_p3 }
  0x48   :  { %p5556_p6 = pnand %p5555_p5, %p5549_p2 }
  0x4a   :  { %5559 = shalt.err (!%p5556_p6)
}
  0x4b   :  { %76 = dma.hbm_to_vmem [thread:$0]  %s6514_s4, 4096, %s71_s21, [#allocation11], %s5594_s29, %s5594_s29, %s5595_s30  }
  0x4c   :  { %5582 = dma.done.wait [#allocation5], 16  }
  0x4d   :  { %5583 = vsyncadd [#allocation5], 4294967280 }
  0x4e   :  { %5584 = dma.done.wait [#allocation3], 1024  }
  0x4f   :  { %5585 = vsyncadd [#allocation3], 4294966272 }
  0x50   :  { %5586 = dma.done.wait [#allocation8], 8192  }
  0x51   :  { %5587 = vsyncadd [#allocation8], 4294959104 }
  0x52   :  { %5588 = dma.done.wait [#allocation11], 4096  }
  0x53   :  { %5589 = vsyncadd [#allocation11], 4294963200 }
  0x54   :  { %104 = sfence }
  0x55   :  { %v126_v0 = vld [vmem:[#allocation9] sm:$0xff]  ;;  %v127_v1 = vld [vmem:[#allocation9 + $0x8] sm:$0xff]  ;;  %v5599_v3 = vmov 0.0|0.0   ;;  %v128_v6 = vld [vmem:[#allocation9 + $0x10] sm:$0xff]  ;;  %vm5600_vm0 = vmmov 0   ;;  %v5601_v11 = vmov 0.0  }
  0x56   :  { %v110_v2 = vld [vmem:[#allocation7] sm:$0xff]  ;;  %4584 = vmatprep.subr.bf16.mxu0 %v5599_v3  ;;  %4608 = vmatprep.subr.bf16.mxu1 %v5599_v3  ;;  %v5745_v4 = vpack.c.bf16 %v127_v1, %v126_v0  ;;  %v111_v5 = vld [vmem:[#allocation7 + $0x8] sm:$0xff]  ;;  %v129_v7 = vld [vmem:[#allocation9 + $0x18] sm:$0xff]  ;;  %s5603_s2 = smov 3   ;;  %s5604_s18 = smov 4   ;;  %vm2724_vm1 = vcmask 7168  }
  0x57   :  { %v5747_v8 = vpack.c.bf16 %v111_v5, %v110_v2  ;;  %v112_v9 = vld [vmem:[#allocation7 + $0x10] sm:$0xff]  ;;  %v113_v10 = vld [vmem:[#allocation7 + $0x18] sm:$0xff]  ;;  %3426 = vmatprep.mubr.msk.f32.mxu0 %vm5600_vm0, %v5601_v11  ;;  %3461 = vmatprep.mubr.msk.f32.mxu1 %vm5600_vm0, %v5601_v11  ;;  %v5754_v12 = vpack.c.bf16 %v129_v7, %v128_v6  ;;  %v130_v14 = vld [vmem:[#allocation9 + $0x20] sm:$0xff]  ;;  %s5605_s26 = smov 5   ;;  %s5606_s1 = smov 6   ;;  %vm2726_vm2 = vcmask 15360  }
  0x58   :  { %4586 = vmatpush3.bf16.msra.mxu0 %v5745_v4  ;;  %v5758_v13 = vpack.c.bf16 %v113_v10, %v112_v9  ;;  %v131_v15 = vld [vmem:[#allocation9 + $0x28] sm:$0xff]  ;;  %v114_v16 = vld [vmem:[#allocation7 + $0x20] sm:$0xff]  ;;  %v132_v20 = vld [vmem:[#allocation9 + $0x30] sm:$0xff]  ;;  %s5607_s20 = smov 7   ;;  %s5608_s12 = smov 1   ;;  %vm2728_vm3 = vcmask 23552  }
  0x59   :  { %4610 = vmatpush3.bf16.msra.mxu1 %v5747_v8  ;;  %4587 = vmatprep.subr.bf16.mxu0 %v5599_v3  ;;  %v115_v17 = vld [vmem:[#allocation7 + $0x28] sm:$0xff]  ;;  %v5762_v18 = vpack.c.bf16 %v131_v15, %v130_v14  ;;  %v133_v21 = vld [vmem:[#allocation9 + $0x38] sm:$0xff]  ;;  %v116_v22 = vld [vmem:[#allocation7 + $0x30] sm:$0xff]  ;;  %vm2730_vm4 = vcmask 31744   ;;  %vm2732_vm5 = vcmask 39936   ;;  %vm2734_vm6 = vcmask 48128  }
  0x5a   :  { %4611 = vmatprep.subr.bf16.mxu1 %v5599_v3  ;;  %v5766_v19 = vpack.c.bf16 %v115_v17, %v114_v16  ;;  %v117_v23 = vld [vmem:[#allocation7 + $0x38] sm:$0xff]  ;;  %v5770_v24 = vpack.c.bf16 %v133_v21, %v132_v20  ;;  %v134_v26 = vld [vmem:[#allocation9 + $0x40] sm:$0xff]  ;;  %v135_v27 = vld [vmem:[#allocation9 + $0x48] sm:$0xff]  ;;  %vm2736_vm7 = vcmask 56320   ;;  %vm2746_vm8 = vcmask 64512   ;;  %s2805_s3 = sld [smem:[#allocation2 + $0x1]] }
  0x5b   :  { %v5774_v25 = vpack.c.bf16 %v117_v23, %v116_v22  ;;  %v118_v28 = vld [vmem:[#allocation7 + $0x40] sm:$0xff]  ;;  %v119_v29 = vld [vmem:[#allocation7 + $0x48] sm:$0xff]  ;;  %v5778_v30 = vpack.c.bf16 %v135_v27, %v134_v26  ;;  %v136_v32 = vld [vmem:[#allocation9 + $0x50] sm:$0xff]  ;;  %s2807_s4 = sld [smem:[#allocation2 + $0x3]]  ;;  %s5610_s29 = smov [#allocation12]  }
  0x5c   :  { %4589 = vmatpush3.bf16.msra.mxu0 %v5754_v12  ;;  %v5782_v31 = vpack.c.bf16 %v119_v29, %v118_v28  ;;  %v137_v33 = vld [vmem:[#allocation9 + $0x58] sm:$0xff]  ;;  %v120_v34 = vld [vmem:[#allocation7 + $0x50] sm:$0xff]  ;;  %v138_v38 = vld [vmem:[#allocation9 + $0x60] sm:$0xff]  ;;  %s2793_s30 = sshll.u32 %s5610_s29, 4  ;;  %s2794_s30 = int_to_ptr.vmem [resolvable:$true] %s2793_s30 }
  0x5d   :  { %4613 = vmatpush3.bf16.msra.mxu1 %v5758_v13  ;;  %4590 = vmatprep.subr.bf16.mxu0 %v5599_v3  ;;  %v121_v35 = vld [vmem:[#allocation7 + $0x58] sm:$0xff]  ;;  %v5786_v36 = vpack.c.bf16 %v137_v33, %v136_v32  ;;  %v139_v39 = vld [vmem:[#allocation9 + $0x68] sm:$0xff]  ;;  %v122_v40 = vld [vmem:[#allocation7 + $0x60] sm:$0xff]  ;;  %s5560_s21 = scalar_lea.vmem %s2794_s30, 128  ;;  %p5565_p8 = scmp.lt.s32.totalorder %s2794_s30, %s2794_s30 }
  0x5e   :  { %4614 = vmatprep.subr.bf16.mxu1 %v5599_v3  ;;  %v5790_v37 = vpack.c.bf16 %v121_v35, %v120_v34  ;;  %v123_v41 = vld [vmem:[#allocation7 + $0x68] sm:$0xff]  ;;  %v5794_v42 = vpack.c.bf16 %v139_v39, %v138_v38  ;;  %v140_v44 = vld [vmem:[#allocation9 + $0x70] sm:$0xff]  ;;  %v141_v45 = vld [vmem:[#allocation9 + $0x78] sm:$0xff]  ;;  %p5561_p7 = scmp.ne.s32.totalorder %s2794_s30, %s5560_s21  ;;  %p5566_p9 = scmp.lt.s32.totalorder %s5560_s21, %s5560_s21 }
  0x5f   :  { %v5798_v43 = vpack.c.bf16 %v123_v41, %v122_v40  ;;  %v124_v46 = vld [vmem:[#allocation7 + $0x70] sm:$0xff]  ;;  %v125_v47 = vld [vmem:[#allocation7 + $0x78] sm:$0xff]  ;;  %v5802_v48 = vpack.c.bf16 %v141_v45, %v140_v44  ;;  %v309_v50 = vld [vmem:[#allocation9 + $0x80] sm:$0xff] }
  0x60   :  { %4592 = vmatpush3.bf16.msra.mxu0 %v5762_v18  ;;  %v5806_v49 = vpack.c.bf16 %v125_v47, %v124_v46  ;;  %v310_v51 = vld [vmem:[#allocation9 + $0x88] sm:$0xff]  ;;  %v292_v52 = vld [vmem:[#allocation7 + $0x80] sm:$0xff]  ;;  %v311_v56 = vld [vmem:[#allocation9 + $0x90] sm:$0xff]  ;;  %p5567_p10 = por %p5566_p9, %p5565_p8 }
  0x61   :  { %4616 = vmatpush3.bf16.msra.mxu1 %v5766_v19  ;;  %4593 = vmatprep.subr.bf16.mxu0 %v5599_v3  ;;  %v293_v53 = vld [vmem:[#allocation7 + $0x88] sm:$0xff]  ;;  %v5810_v54 = vpack.c.bf16 %v310_v51, %v309_v50  ;;  %v109_v55 = vld [vmem:[#allocation6] sm:$0xff]  ;;  %v312_v57 = vld [vmem:[#allocation9 + $0x98] sm:$0xff] }
  0x62   :  { %4617 = vmatprep.subr.bf16.mxu1 %v5599_v3  ;;  %v5815_v58 = vpack.c.bf16 %v293_v53, %v292_v52  ;;  %v294_v59 = vld [vmem:[#allocation7 + $0x90] sm:$0xff]  ;;  %v295_v60 = vld [vmem:[#allocation7 + $0x98] sm:$0xff]  ;;  %v5819_v61 = vpack.c.bf16 %v312_v57, %v311_v56  ;;  %v313_v62 = vld [vmem:[#allocation9 + $0xa0] sm:$0xff]  ;;  %p5568_p11 = pnand %p5567_p10, %p5561_p7 }
  0x63   :  { %v314_v63 = vld [vmem:[#allocation9 + $0xa8] sm:$0xff]  ;;  %v5825_v0 = vpack.c.bf16 %v295_v60, %v294_v59  ;;  %v296_v1 = vld [vmem:[#allocation7 + $0xa0] sm:$0xff]  ;;  %v315_v6 = vld [vmem:[#allocation9 + $0xb0] sm:$0xff] }
  0x64   :  { %4595 = vmatpush3.bf16.msra.mxu0 %v5770_v24  ;;  %v297_v2 = vld [vmem:[#allocation7 + $0xa8] sm:$0xff]  ;;  %v5831_v5 = vpack.c.bf16 %v314_v63, %v313_v62  ;;  %v316_v7 = vld [vmem:[#allocation9 + $0xb8] sm:$0xff]  ;;  %v298_v10 = vld [vmem:[#allocation7 + $0xb0] sm:$0xff] }
  0x65   :  { %4619 = vmatpush3.bf16.msra.mxu1 %v5774_v25  ;;  %4596 = vmatprep.subr.bf16.mxu0 %v5599_v3  ;;  %v5835_v9 = vpack.c.bf16 %v297_v2, %v296_v1  ;;  %v299_v14 = vld [vmem:[#allocation7 + $0xb8] sm:$0xff]  ;;  %v5839_v15 = vpack.c.bf16 %v316_v7, %v315_v6  ;;  %v317_v16 = vld [vmem:[#allocation9 + $0xc0] sm:$0xff]  ;;  %v318_v17 = vld [vmem:[#allocation9 + $0xc8] sm:$0xff] }
  0x66   :  { %4620 = vmatprep.subr.bf16.mxu1 %v5599_v3  ;;  %v5843_v20 = vpack.c.bf16 %v299_v14, %v298_v10  ;;  %v5847_v21 = vpack.c.bf16 %v318_v17, %v317_v16  ;;  %v319_v22 = vld [vmem:[#allocation9 + $0xd0] sm:$0xff]  ;;  %v320_v23 = vld [vmem:[#allocation9 + $0xd8] sm:$0xff]  ;;  %v321_v27 = vld [vmem:[#allocation9 + $0xe0] sm:$0xff] }
  0x67   :  { %v5853_v26 = vpack.c.bf16 %v320_v23, %v319_v22  ;;  %v322_v28 = vld [vmem:[#allocation9 + $0xe8] sm:$0xff]  ;;  %v323_v32 = vld [vmem:[#allocation9 + $0xf0] sm:$0xff]  ;;  %v324_v33 = vld [vmem:[#allocation9 + $0xf8] sm:$0xff] }
  0x68   :  { %4598 = vmatpush3.bf16.msra.mxu0 %v5778_v30  ;;  %v5857_v29 = vpack.c.bf16 %v322_v28, %v321_v27  ;;  %v5861_v34 = vpack.c.bf16 %v324_v33, %v323_v32  ;;  %v300_v35 = vld [vmem:[#allocation7 + $0xc0] sm:$0xff]  ;;  %v301_v38 = vld [vmem:[#allocation7 + $0xc8] sm:$0xff]  ;;  %v302_v40 = vld [vmem:[#allocation7 + $0xd0] sm:$0xff] }
  0x69   :  { %4622 = vmatpush3.bf16.msra.mxu1 %v5782_v31  ;;  %4599 = vmatprep.subr.bf16.mxu0 %v5599_v3  ;;  %v5885_v39 = vpack.c.bf16 %v301_v38, %v300_v35  ;;  %v303_v41 = vld [vmem:[#allocation7 + $0xd8] sm:$0xff]  ;;  %v304_v45 = vld [vmem:[#allocation7 + $0xe0] sm:$0xff]  ;;  %v305_v46 = vld [vmem:[#allocation7 + $0xe8] sm:$0xff] }
  0x6a   :  { %4623 = vmatprep.subr.bf16.mxu1 %v5599_v3  ;;  %v5889_v44 = vpack.c.bf16 %v303_v41, %v302_v40  ;;  %v306_v47 = vld [vmem:[#allocation7 + $0xf0] sm:$0xff]  ;;  %v5893_v50 = vpack.c.bf16 %v305_v46, %v304_v45  ;;  %v307_v51 = vld [vmem:[#allocation7 + $0xf8] sm:$0xff]  ;;  %v476_v6 = vld [vmem:[#allocation6 + $0x8] sm:$0xff] }
  0x6b   :  { %v5896_v52 = vpack.c.bf16 %v307_v51, %v306_v47  ;;  %v5904_v56 = vld [vmem:[%s6515_s5] ss:$0 sm:$0xff]  ;;  %v5964_v10 = vld [vmem:[%s6515_s5 + $0x1] ss:$0 sm:$0xff]  ;;  %v762_v40 = vld [vmem:[#allocation6 + $0x10] sm:$0xff] }
  0x6c   :  { %4601 = vmatpush3.bf16.msra.mxu0 %v5786_v36 }
  0x6d   :  { %4625 = vmatpush3.bf16.msra.mxu1 %v5790_v37  ;;  %4602 = vmatprep.subr.bf16.mxu0 %v5599_v3 }
  0x6e   :  { %4626 = vmatprep.subr.bf16.mxu1 %v5599_v3 }
  0x70   :  { %4604 = vmatpush3.bf16.msra.mxu0 %v5794_v42 }
  0x71   :  { %4628 = vmatpush3.bf16.msra.mxu1 %v5798_v43  ;;  %4605 = vmatprep.subr.bf16.mxu0 %v5599_v3 }
  0x72   :  { %4629 = vmatprep.subr.bf16.mxu1 %v5599_v3 }
  0x74   :  { %4607 = vmatpush3.bf16.msra.mxu0 %v5802_v48 }
  0x75   :  { %4631 = vmatpush3.bf16.msra.mxu1 %v5806_v49  ;;  %4632 = vmatprep.subr.bf16.mxu0 %v5599_v3 }
  0x76   :  { %4656 = vmatprep.subr.bf16.mxu1 %v5599_v3 }
  0x77   :  { %3427 = vmatmul.mubr.f32.vlgmr.msra.gmra.mrb[0].mxu0 %v5601_v11 }
  0x78   :  { %3462 = vmatmul.mubr.f32.vlgmr.msra.gmra.mrb[0].mxu1 %v109_v55  ;;  %4634 = vmatpush3.bf16.msra.mxu0 %v5810_v54 }
  0x79   :  { %4635 = vmatprep.subr.bf16.mxu0 %v5599_v3  ;;  %3496 = vmatprep.mubr.msk.f32.mxu0 %vm5600_vm0, %v5601_v11 }
  0x7a   :  { %4658 = vmatpush3.bf16.msra.mxu1 %v5815_v58  ;;  %3531 = vmatprep.mubr.msk.f32.mxu1 %vm5600_vm0, %v5601_v11 }
  0x7b   :  { %4659 = vmatprep.subr.bf16.mxu1 %v5599_v3 }
  0x7c   :  { %4637 = vmatpush3.bf16.msra.mxu0 %v5819_v61 }
  0x7d   :  { %4638 = vmatprep.subr.bf16.mxu0 %v5599_v3 }
  0x7e   :  { %4661 = vmatpush3.bf16.msra.mxu1 %v5825_v0 }
  0x7f   :  { %4662 = vmatprep.subr.bf16.mxu1 %v5599_v3 }
  0x80   :  { %4640 = vmatpush3.bf16.msra.mxu0 %v5831_v5 }
  0x81   :  { %4641 = vmatprep.subr.bf16.mxu0 %v5599_v3 }
  0x82   :  { %4664 = vmatpush3.bf16.msra.mxu1 %v5835_v9 }
  0x83   :  { %4665 = vmatprep.subr.bf16.mxu1 %v5599_v3 }
  0x84   :  { %4643 = vmatpush3.bf16.msra.mxu0 %v5839_v15 }
  0x85   :  { %4644 = vmatprep.subr.bf16.mxu0 %v5599_v3 }
  0x86   :  { %4667 = vmatpush3.bf16.msra.mxu1 %v5843_v20 }
  0x87   :  { %4668 = vmatprep.subr.bf16.mxu1 %v5599_v3 }
  0x88   :  { %4646 = vmatpush3.bf16.msra.mxu0 %v5847_v21 }
  0x89   :  { %4647 = vmatprep.subr.bf16.mxu0 %v5599_v3 }
  0x8a   :  { %4670 = vmatpush3.bf16.msra.mxu1 %v5885_v39 }
  0x8b   :  { %4671 = vmatprep.subr.bf16.mxu1 %v5599_v3 }
  0x8c   :  { %4649 = vmatpush3.bf16.msra.mxu0 %v5853_v26 }
  0x8d   :  { %4650 = vmatprep.subr.bf16.mxu0 %v5599_v3 }
  0x8e   :  { %4673 = vmatpush3.bf16.msra.mxu1 %v5889_v44 }
  0x8f   :  { %4674 = vmatprep.subr.bf16.mxu1 %v5599_v3 }
  0x90   :  { %4652 = vmatpush3.bf16.msra.mxu0 %v5857_v29 }
  0x91   :  { %4653 = vmatprep.subr.bf16.mxu0 %v5599_v3 }
  0x92   :  { %4676 = vmatpush3.bf16.msra.mxu1 %v5893_v50 }
  0x93   :  { %4677 = vmatprep.subr.bf16.mxu1 %v5599_v3 }
  0x94   :  { %4655 = vmatpush3.bf16.msra.mxu0 %v5861_v34 }
  0x95   :  { %4680 = vmatprep.subr.bf16.mxu0 %v5599_v3 }
  0x96   :  { %4679 = vmatpush3.bf16.msra.mxu1 %v5896_v52 }
  0x97   :  { %3497 = vmatmul.mubr.f32.vlgmr.msra.gmra.mrb[2].mxu0 %v5601_v11  ;;  %4704 = vmatprep.subr.bf16.mxu1 %v5599_v3 }
  0x98   :  { %4682 = vmatpush3.bf16.msra.mxu0 %v5745_v4  ;;  %3566 = vmatprep.mubr.msk.f32.mxu0 %vm5600_vm0, %v5601_v11 }
  0x99   :  { %4683 = vmatprep.subr.bf16.mxu0 %v5599_v3 }
  0x9c   :  { %4685 = vmatpush3.bf16.msra.mxu0 %v5754_v12 }
  0x9d   :  { %4686 = vmatprep.subr.bf16.mxu0 %v5599_v3 }
  0xa0   :  { %4688 = vmatpush3.bf16.msra.mxu0 %v5762_v18 }
  0xa1   :  { %4689 = vmatprep.subr.bf16.mxu0 %v5599_v3 }
  0xa4   :  { %4691 = vmatpush3.bf16.msra.mxu0 %v5770_v24 }
  0xa5   :  { %4692 = vmatprep.subr.bf16.mxu0 %v5599_v3 }
  0xa8   :  { %4694 = vmatpush3.bf16.msra.mxu0 %v5778_v30 }
  0xa9   :  { %4695 = vmatprep.subr.bf16.mxu0 %v5599_v3 }
  0xac   :  { %4697 = vmatpush3.bf16.msra.mxu0 %v5786_v36 }
  0xad   :  { %4698 = vmatprep.subr.bf16.mxu0 %v5599_v3 }
  0xb0   :  { %4700 = vmatpush3.bf16.msra.mxu0 %v5794_v42 }
  0xb1   :  { %4701 = vmatprep.subr.bf16.mxu0 %v5599_v3 }
  0xb4   :  { %4703 = vmatpush3.bf16.msra.mxu0 %v5802_v48 }
  0xb5   :  { %4728 = vmatprep.subr.bf16.mxu0 %v5599_v3 }
 0x14a   :  { %v208_v53 = vpop.f32.mrb[0].mxu0 }
 0x14b   :  { %v278_v55 = vpop.f32.mrb[0].mxu1  ;;  %v3428_v57 = vpop.f32.mrb[1].mxu0 }
 0x14c   :  { %v279_v59 = vadd.f32 %v278_v55, %v208_v53  ;;  %v3463_v60 = vpop.f32.mrb[1].mxu1 }
 0x14e   :  { %v289_v62 = vadd.f32 %v5904_v56, %v279_v59 }
 0x150   :  { %5419 = vtanh.f32 %v289_v62 }
 0x15a   :  { %v5420_v63 = vpop.eup %5419 }
 0x15b   :  { %3532 = vmatmul.mubr.f32.vlgmr.msra.gmra.mrb[2].mxu1 %v5420_v63  ;;  %3567 = vmatmul.mubr.f32.vlgmr.msra.gmra.mrb[4].mxu0 %v5420_v63 }
 0x15c   :  { %4706 = vmatpush3.bf16.msra.mxu1 %v5747_v8  ;;  %3601 = vmatprep.mubr.msk.f32.mxu1 %vm5600_vm0, %v5601_v11 }
 0x15d   :  { %4707 = vmatprep.subr.bf16.mxu1 %v5599_v3  ;;  %4730 = vmatpush3.bf16.msra.mxu0 %v5810_v54 }
 0x15e   :  { %4731 = vmatprep.subr.bf16.mxu0 %v5599_v3  ;;  %3636 = vmatprep.mubr.msk.f32.mxu0 %vm5600_vm0, %v5601_v11 }
 0x160   :  { %4709 = vmatpush3.bf16.msra.mxu1 %v5758_v13 }
 0x161   :  { %4710 = vmatprep.subr.bf16.mxu1 %v5599_v3  ;;  %4733 = vmatpush3.bf16.msra.mxu0 %v5819_v61 }
 0x162   :  { %4734 = vmatprep.subr.bf16.mxu0 %v5599_v3 }
 0x164   :  { %4712 = vmatpush3.bf16.msra.mxu1 %v5766_v19 }
 0x165   :  { %4713 = vmatprep.subr.bf16.mxu1 %v5599_v3  ;;  %4736 = vmatpush3.bf16.msra.mxu0 %v5831_v5 }
 0x166   :  { %4737 = vmatprep.subr.bf16.mxu0 %v5599_v3 }
 0x168   :  { %4715 = vmatpush3.bf16.msra.mxu1 %v5774_v25 }
 0x169   :  { %4716 = vmatprep.subr.bf16.mxu1 %v5599_v3  ;;  %4739 = vmatpush3.bf16.msra.mxu0 %v5839_v15 }
 0x16a   :  { %v391_v1 = vpop.f32.mrb[2].mxu0  ;;  %4740 = vmatprep.subr.bf16.mxu0 %v5599_v3 }
 0x16b   :  { %v3498_v2 = vpop.f32.mrb[3].mxu0 }
 0x16c   :  { %4718 = vmatpush3.bf16.msra.mxu1 %v5782_v31 }
 0x16d   :  { %4719 = vmatprep.subr.bf16.mxu1 %v5599_v3  ;;  %4742 = vmatpush3.bf16.msra.mxu0 %v5847_v21 }
 0x16e   :  { %4743 = vmatprep.subr.bf16.mxu0 %v5599_v3 }
 0x170   :  { %4721 = vmatpush3.bf16.msra.mxu1 %v5790_v37 }
 0x171   :  { %4722 = vmatprep.subr.bf16.mxu1 %v5599_v3  ;;  %4745 = vmatpush3.bf16.msra.mxu0 %v5853_v26 }
 0x172   :  { %4746 = vmatprep.subr.bf16.mxu0 %v5599_v3 }
 0x174   :  { %4724 = vmatpush3.bf16.msra.mxu1 %v5798_v43 }
 0x175   :  { %4725 = vmatprep.subr.bf16.mxu1 %v5599_v3  ;;  %4748 = vmatpush3.bf16.msra.mxu0 %v5857_v29 }
 0x176   :  { %4749 = vmatprep.subr.bf16.mxu0 %v5599_v3 }
 0x178   :  { %4727 = vmatpush3.bf16.msra.mxu1 %v5806_v49 }
 0x179   :  { %4751 = vmatpush3.bf16.msra.mxu0 %v5861_v34  ;;  %4752 = vmatprep.subr.bf16.mxu1 %v5599_v3 }
 0x17a   :  { %4776 = vmatprep.subr.bf16.mxu0 %v5599_v3 }
 0x17b   :  { %3602 = vmatmul.mubr.f32.vlgmr.msra.gmra.mrb[4].mxu1 %v476_v6  ;;  %v6093_v6 = vld [vmem:[#allocation6 + $0x18] sm:$0xff] }
 0x17c   :  { %4754 = vmatpush3.bf16.msra.mxu1 %v5815_v58  ;;  %3671 = vmatprep.mubr.msk.f32.mxu1 %vm5600_vm0, %v5601_v11 }
 0x17d   :  { %4755 = vmatprep.subr.bf16.mxu1 %v5599_v3 }
 0x180   :  { %4757 = vmatpush3.bf16.msra.mxu1 %v5825_v0 }
 0x181   :  { %4758 = vmatprep.subr.bf16.mxu1 %v5599_v3 }
 0x184   :  { %4760 = vmatpush3.bf16.msra.mxu1 %v5835_v9 }
 0x185   :  { %4761 = vmatprep.subr.bf16.mxu1 %v5599_v3 }
 0x188   :  { %4763 = vmatpush3.bf16.msra.mxu1 %v5843_v20 }
 0x189   :  { %4764 = vmatprep.subr.bf16.mxu1 %v5599_v3 }
 0x18c   :  { %4766 = vmatpush3.bf16.msra.mxu1 %v5885_v39 }
 0x18d   :  { %4767 = vmatprep.subr.bf16.mxu1 %v5599_v3 }
 0x190   :  { %4769 = vmatpush3.bf16.msra.mxu1 %v5889_v44 }
 0x191   :  { %4770 = vmatprep.subr.bf16.mxu1 %v5599_v3 }
 0x194   :  { %4772 = vmatpush3.bf16.msra.mxu1 %v5893_v50 }
 0x195   :  { %4773 = vmatprep.subr.bf16.mxu1 %v5599_v3 }
 0x198   :  { %4775 = vmatpush3.bf16.msra.mxu1 %v5896_v52 }
 0x199   :  { %4800 = vmatprep.subr.bf16.mxu1 %v5599_v3 }
 0x22e   :  { %v461_v7 = vpop.f32.mrb[2].mxu1  ;;  %v543_v14 = vpop.f32.mrb[4].mxu0 }
 0x22f   :  { %v462_v16 = vadd.f32 %v461_v7, %v391_v1  ;;  %v3533_v17 = vpop.f32.mrb[3].mxu1  ;;  %v3568_v22 = vpop.f32.mrb[5].mxu0 }
 0x231   :  { %v473_v23 = vadd.f32 %v5964_v10, %v462_v16 }
 0x233   :  { %5421 = vtanh.f32 %v473_v23 }
 0x23d   :  { %v5422_v27 = vpop.eup %5421 }
 0x23e   :  { %3637 = vmatmul.mubr.f32.vlgmr.msra.gmra.mrb[6].mxu0 %v5422_v27 }
 0x23f   :  { %4778 = vmatpush3.bf16.msra.mxu0 %v5745_v4  ;;  %3706 = vmatprep.mubr.msk.f32.mxu0 %vm5600_vm0, %v5601_v11 }
 0x240   :  { %4779 = vmatprep.subr.bf16.mxu0 %v5599_v3 }
 0x243   :  { %4781 = vmatpush3.bf16.msra.mxu0 %v5754_v12 }
 0x244   :  { %4782 = vmatprep.subr.bf16.mxu0 %v5599_v3 }
 0x247   :  { %4784 = vmatpush3.bf16.msra.mxu0 %v5762_v18 }
 0x248   :  { %4785 = vmatprep.subr.bf16.mxu0 %v5599_v3 }
 0x24b   :  { %4787 = vmatpush3.bf16.msra.mxu0 %v5770_v24 }
 0x24c   :  { %4788 = vmatprep.subr.bf16.mxu0 %v5599_v3 }
 0x24e   :  { %v613_v28 = vpop.f32.mrb[4].mxu1 }
 0x24f   :  { %v614_v32 = vadd.f32 %v613_v28, %v543_v14  ;;  %v3603_v33 = vpop.f32.mrb[5].mxu1  ;;  %4790 = vmatpush3.bf16.msra.mxu0 %v5778_v30 }
 0x250   :  { %4791 = vmatprep.subr.bf16.mxu0 %v5599_v3 }
 0x251   :  { %v617_v35 = vadd.f32 %v5904_v56, %v614_v32 }
 0x253   :  { %5423 = vtanh.f32 %v617_v35  ;;  %4793 = vmatpush3.bf16.msra.mxu0 %v5786_v36 }
 0x254   :  { %4794 = vmatprep.subr.bf16.mxu0 %v5599_v3 }
 0x257   :  { %4796 = vmatpush3.bf16.msra.mxu0 %v5794_v42 }
 0x258   :  { %4797 = vmatprep.subr.bf16.mxu0 %v5599_v3 }
 0x25b   :  { %4799 = vmatpush3.bf16.msra.mxu0 %v5802_v48 }
 0x25c   :  { %4824 = vmatprep.subr.bf16.mxu0 %v5599_v3 }
 0x25d   :  { %v5424_v38 = vpop.eup %5423 }
 0x25e   :  { %3672 = vmatmul.mubr.f32.vlgmr.msra.gmra.mrb[6].mxu1 %v5424_v38  ;;  %3707 = vmatmul.mubr.f32.vlgmr.msra.gmra.mrb[8].mxu0 %v5424_v38 }
 0x25f   :  { %4802 = vmatpush3.bf16.msra.mxu1 %v5747_v8  ;;  %3741 = vmatprep.mubr.msk.f32.mxu1 %vm5600_vm0, %v5601_v11 }
 0x260   :  { %4803 = vmatprep.subr.bf16.mxu1 %v5599_v3  ;;  %4826 = vmatpush3.bf16.msra.mxu0 %v5810_v54 }
 0x261   :  { %4827 = vmatprep.subr.bf16.mxu0 %v5599_v3  ;;  %3776 = vmatprep.mubr.msk.f32.mxu0 %vm5600_vm0, %v5601_v11 }
 0x263   :  { %4805 = vmatpush3.bf16.msra.mxu1 %v5758_v13 }
 0x264   :  { %4806 = vmatprep.subr.bf16.mxu1 %v5599_v3  ;;  %4829 = vmatpush3.bf16.msra.mxu0 %v5819_v61 }
 0x265   :  { %4830 = vmatprep.subr.bf16.mxu0 %v5599_v3 }
 0x267   :  { %4808 = vmatpush3.bf16.msra.mxu1 %v5766_v19 }
 0x268   :  { %4809 = vmatprep.subr.bf16.mxu1 %v5599_v3  ;;  %4832 = vmatpush3.bf16.msra.mxu0 %v5831_v5 }
 0x269   :  { %4833 = vmatprep.subr.bf16.mxu0 %v5599_v3 }
 0x26b   :  { %4811 = vmatpush3.bf16.msra.mxu1 %v5774_v25 }
 0x26c   :  { %4812 = vmatprep.subr.bf16.mxu1 %v5599_v3  ;;  %4835 = vmatpush3.bf16.msra.mxu0 %v5839_v15 }
 0x26d   :  { %4836 = vmatprep.subr.bf16.mxu0 %v5599_v3 }
 0x26f   :  { %4814 = vmatpush3.bf16.msra.mxu1 %v5782_v31 }
 0x270   :  { %4815 = vmatprep.subr.bf16.mxu1 %v5599_v3  ;;  %4838 = vmatpush3.bf16.msra.mxu0 %v5847_v21 }
 0x271   :  { %4839 = vmatprep.subr.bf16.mxu0 %v5599_v3 }
 0x273   :  { %4817 = vmatpush3.bf16.msra.mxu1 %v5790_v37 }
 0x274   :  { %4818 = vmatprep.subr.bf16.mxu1 %v5599_v3  ;;  %4841 = vmatpush3.bf16.msra.mxu0 %v5853_v26 }
 0x275   :  { %4842 = vmatprep.subr.bf16.mxu0 %v5599_v3 }
 0x277   :  { %4820 = vmatpush3.bf16.msra.mxu1 %v5798_v43 }
 0x278   :  { %4821 = vmatprep.subr.bf16.mxu1 %v5599_v3  ;;  %4844 = vmatpush3.bf16.msra.mxu0 %v5857_v29 }
 0x279   :  { %4845 = vmatprep.subr.bf16.mxu0 %v5599_v3 }
 0x27b   :  { %4823 = vmatpush3.bf16.msra.mxu1 %v5806_v49 }
 0x27c   :  { %4847 = vmatpush3.bf16.msra.mxu0 %v5861_v34  ;;  %4848 = vmatprep.subr.bf16.mxu1 %v5599_v3 }
 0x27d   :  { %4872 = vmatprep.subr.bf16.mxu0 %v5599_v3 }
 0x27e   :  { %3742 = vmatmul.mubr.f32.vlgmr.msra.gmra.mrb[8].mxu1 %v762_v40 }
 0x27f   :  { %4850 = vmatpush3.bf16.msra.mxu1 %v5815_v58  ;;  %3811 = vmatprep.mubr.msk.f32.mxu1 %vm5600_vm0, %v5601_v11 }
 0x280   :  { %4851 = vmatprep.subr.bf16.mxu1 %v5599_v3 }
 0x283   :  { %4853 = vmatpush3.bf16.msra.mxu1 %v5825_v0 }
 0x284   :  { %4854 = vmatprep.subr.bf16.mxu1 %v5599_v3 }
 0x287   :  { %4856 = vmatpush3.bf16.msra.mxu1 %v5835_v9 }
 0x288   :  { %4857 = vmatprep.subr.bf16.mxu1 %v5599_v3 }
 0x28b   :  { %4859 = vmatpush3.bf16.msra.mxu1 %v5843_v20 }
 0x28c   :  { %4860 = vmatprep.subr.bf16.mxu1 %v5599_v3 }
 0x28f   :  { %4862 = vmatpush3.bf16.msra.mxu1 %v5885_v39 }
 0x290   :  { %4863 = vmatprep.subr.bf16.mxu1 %v5599_v3 }
 0x293   :  { %4865 = vmatpush3.bf16.msra.mxu1 %v5889_v44 }
 0x294   :  { %4866 = vmatprep.subr.bf16.mxu1 %v5599_v3 }
 0x297   :  { %4868 = vmatpush3.bf16.msra.mxu1 %v5893_v50 }
 0x298   :  { %4869 = vmatprep.subr.bf16.mxu1 %v5599_v3 }
 0x29b   :  { %4871 = vmatpush3.bf16.msra.mxu1 %v5896_v52 }
 0x29c   :  { %4896 = vmatprep.subr.bf16.mxu1 %v5599_v3 }
 0x311   :  { %v685_v41 = vpop.f32.mrb[6].mxu0 }
 0x312   :  { %v3638_v45 = vpop.f32.mrb[7].mxu0 }
 0x313   :  { %v6170_v45 = vld [vmem:[#allocation6 + $0x20] sm:$0xff] }
 0x331   :  { %v755_v46 = vpop.f32.mrb[6].mxu1  ;;  %v829_v47 = vpop.f32.mrb[8].mxu0 }
 0x332   :  { %v756_v51 = vadd.f32 %v755_v46, %v685_v41  ;;  %v3673_v53 = vpop.f32.mrb[7].mxu1  ;;  %v3708_v55 = vpop.f32.mrb[9].mxu0 }
 0x334   :  { %v759_v57 = vadd.f32 %v5964_v10, %v756_v51 }
 0x336   :  { %5425 = vtanh.f32 %v759_v57 }
 0x340   :  { %v5426_v59 = vpop.eup %5425 }
 0x341   :  { %3777 = vmatmul.mubr.f32.vlgmr.msra.gmra.mrb[10].mxu0 %v5426_v59 }
 0x342   :  { %4874 = vmatpush3.bf16.msra.mxu0 %v5745_v4  ;;  %3846 = vmatprep.mubr.msk.f32.mxu0 %vm5600_vm0, %v5601_v11 }
 0x343   :  { %4875 = vmatprep.subr.bf16.mxu0 %v5599_v3 }
 0x346   :  { %4877 = vmatpush3.bf16.msra.mxu0 %v5754_v12 }
 0x347   :  { %4878 = vmatprep.subr.bf16.mxu0 %v5599_v3 }
 0x34a   :  { %4880 = vmatpush3.bf16.msra.mxu0 %v5762_v18 }
 0x34b   :  { %4881 = vmatprep.subr.bf16.mxu0 %v5599_v3 }
 0x34e   :  { %4883 = vmatpush3.bf16.msra.mxu0 %v5770_v24 }
 0x34f   :  { %4884 = vmatprep.subr.bf16.mxu0 %v5599_v3 }
 0x351   :  { %v899_v60 = vpop.f32.mrb[8].mxu1 }
 0x352   :  { %v900_v62 = vadd.f32 %v899_v60, %v829_v47  ;;  %v3743_v63 = vpop.f32.mrb[9].mxu1  ;;  %4886 = vmatpush3.bf16.msra.mxu0 %v5778_v30 }
 0x353   :  { %4887 = vmatprep.subr.bf16.mxu0 %v5599_v3 }
 0x354   :  { %v903_v1 = vadd.f32 %v5904_v56, %v900_v62 }
 0x356   :  { %5427 = vtanh.f32 %v903_v1  ;;  %4889 = vmatpush3.bf16.msra.mxu0 %v5786_v36 }
 0x357   :  { %4890 = vmatprep.subr.bf16.mxu0 %v5599_v3 }
 0x35a   :  { %4892 = vmatpush3.bf16.msra.mxu0 %v5794_v42 }
 0x35b   :  { %4893 = vmatprep.subr.bf16.mxu0 %v5599_v3 }
 0x35e   :  { %4895 = vmatpush3.bf16.msra.mxu0 %v5802_v48 }
 0x35f   :  { %4920 = vmatprep.subr.bf16.mxu0 %v5599_v3 }
 0x360   :  { %v5428_v2 = vpop.eup %5427 }
 0x361   :  { %3812 = vmatmul.mubr.f32.vlgmr.msra.gmra.mrb[10].mxu1 %v5428_v2  ;;  %3847 = vmatmul.mubr.f32.vlgmr.msra.gmra.mrb[12].mxu0 %v5428_v2 }
 0x362   :  { %4898 = vmatpush3.bf16.msra.mxu1 %v5747_v8  ;;  %3881 = vmatprep.mubr.msk.f32.mxu1 %vm5600_vm0, %v5601_v11 }
 0x363   :  { %4899 = vmatprep.subr.bf16.mxu1 %v5599_v3  ;;  %4922 = vmatpush3.bf16.msra.mxu0 %v5810_v54 }
 0x364   :  { %4923 = vmatprep.subr.bf16.mxu0 %v5599_v3  ;;  %3916 = vmatprep.mubr.msk.f32.mxu0 %vm5600_vm0, %v5601_v11 }
 0x366   :  { %4901 = vmatpush3.bf16.msra.mxu1 %v5758_v13 }
 0x367   :  { %4902 = vmatprep.subr.bf16.mxu1 %v5599_v3  ;;  %4925 = vmatpush3.bf16.msra.mxu0 %v5819_v61 }
 0x368   :  { %4926 = vmatprep.subr.bf16.mxu0 %v5599_v3 }
 0x36a   :  { %4904 = vmatpush3.bf16.msra.mxu1 %v5766_v19 }
 0x36b   :  { %4905 = vmatprep.subr.bf16.mxu1 %v5599_v3  ;;  %4928 = vmatpush3.bf16.msra.mxu0 %v5831_v5 }
 0x36c   :  { %4929 = vmatprep.subr.bf16.mxu0 %v5599_v3 }
 0x36e   :  { %4907 = vmatpush3.bf16.msra.mxu1 %v5774_v25 }
 0x36f   :  { %4908 = vmatprep.subr.bf16.mxu1 %v5599_v3  ;;  %4931 = vmatpush3.bf16.msra.mxu0 %v5839_v15 }
 0x370   :  { %4932 = vmatprep.subr.bf16.mxu0 %v5599_v3 }
 0x372   :  { %4910 = vmatpush3.bf16.msra.mxu1 %v5782_v31 }
 0x373   :  { %4911 = vmatprep.subr.bf16.mxu1 %v5599_v3  ;;  %4934 = vmatpush3.bf16.msra.mxu0 %v5847_v21 }
 0x374   :  { %4935 = vmatprep.subr.bf16.mxu0 %v5599_v3 }
 0x376   :  { %4913 = vmatpush3.bf16.msra.mxu1 %v5790_v37 }
 0x377   :  { %4914 = vmatprep.subr.bf16.mxu1 %v5599_v3  ;;  %4937 = vmatpush3.bf16.msra.mxu0 %v5853_v26 }
 0x378   :  { %4938 = vmatprep.subr.bf16.mxu0 %v5599_v3 }
 0x37a   :  { %4916 = vmatpush3.bf16.msra.mxu1 %v5798_v43 }
 0x37b   :  { %4917 = vmatprep.subr.bf16.mxu1 %v5599_v3  ;;  %4940 = vmatpush3.bf16.msra.mxu0 %v5857_v29 }
 0x37c   :  { %4941 = vmatprep.subr.bf16.mxu0 %v5599_v3 }
 0x37e   :  { %4919 = vmatpush3.bf16.msra.mxu1 %v5806_v49 }
 0x37f   :  { %4943 = vmatpush3.bf16.msra.mxu0 %v5861_v34  ;;  %4944 = vmatprep.subr.bf16.mxu1 %v5599_v3 }
 0x380   :  { %4968 = vmatprep.subr.bf16.mxu0 %v5599_v3 }
 0x381   :  { %3882 = vmatmul.mubr.f32.vlgmr.msra.gmra.mrb[12].mxu1 %v6093_v6 }
 0x382   :  { %4946 = vmatpush3.bf16.msra.mxu1 %v5815_v58  ;;  %3951 = vmatprep.mubr.msk.f32.mxu1 %vm5600_vm0, %v5601_v11 }
 0x383   :  { %4947 = vmatprep.subr.bf16.mxu1 %v5599_v3 }
 0x386   :  { %4949 = vmatpush3.bf16.msra.mxu1 %v5825_v0 }
 0x387   :  { %4950 = vmatprep.subr.bf16.mxu1 %v5599_v3 }
 0x38a   :  { %4952 = vmatpush3.bf16.msra.mxu1 %v5835_v9 }
 0x38b   :  { %4953 = vmatprep.subr.bf16.mxu1 %v5599_v3 }
 0x38e   :  { %4955 = vmatpush3.bf16.msra.mxu1 %v5843_v20 }
 0x38f   :  { %4956 = vmatprep.subr.bf16.mxu1 %v5599_v3 }
 0x392   :  { %4958 = vmatpush3.bf16.msra.mxu1 %v5885_v39 }
 0x393   :  { %4959 = vmatprep.subr.bf16.mxu1 %v5599_v3 }
 0x396   :  { %4961 = vmatpush3.bf16.msra.mxu1 %v5889_v44 }
 0x397   :  { %4962 = vmatprep.subr.bf16.mxu1 %v5599_v3 }
 0x39a   :  { %4964 = vmatpush3.bf16.msra.mxu1 %v5893_v50 }
 0x39b   :  { %4965 = vmatprep.subr.bf16.mxu1 %v5599_v3 }
 0x39e   :  { %4967 = vmatpush3.bf16.msra.mxu1 %v5896_v52 }
 0x39f   :  { %4992 = vmatprep.subr.bf16.mxu1 %v5599_v3 }
 0x414   :  { %v971_v7 = vpop.f32.mrb[10].mxu0 }
 0x415   :  { %v3778_v14 = vpop.f32.mrb[11].mxu0 }
 0x434   :  { %v1041_v16 = vpop.f32.mrb[10].mxu1  ;;  %v1115_v17 = vpop.f32.mrb[12].mxu0 }
 0x435   :  { %v1042_v22 = vadd.f32 %v1041_v16, %v971_v7  ;;  %v3813_v23 = vpop.f32.mrb[11].mxu1  ;;  %v3848_v27 = vpop.f32.mrb[13].mxu0  ;;  %v6247_v16 = vld [vmem:[#allocation6 + $0x28] sm:$0xff] }
 0x437   :  { %v1045_v28 = vadd.f32 %v5964_v10, %v1042_v22 }
 0x439   :  { %5429 = vtanh.f32 %v1045_v28 }
 0x443   :  { %v5430_v32 = vpop.eup %5429 }
 0x444   :  { %3917 = vmatmul.mubr.f32.vlgmr.msra.gmra.mrb[14].mxu0 %v5430_v32 }
 0x445   :  { %4970 = vmatpush3.bf16.msra.mxu0 %v5745_v4  ;;  %3986 = vmatprep.mubr.msk.f32.mxu0 %vm5600_vm0, %v5601_v11 }
 0x446   :  { %4971 = vmatprep.subr.bf16.mxu0 %v5599_v3 }
 0x449   :  { %4973 = vmatpush3.bf16.msra.mxu0 %v5754_v12 }
 0x44a   :  { %4974 = vmatprep.subr.bf16.mxu0 %v5599_v3 }
 0x44d   :  { %4976 = vmatpush3.bf16.msra.mxu0 %v5762_v18 }
 0x44e   :  { %4977 = vmatprep.subr.bf16.mxu0 %v5599_v3 }
 0x451   :  { %4979 = vmatpush3.bf16.msra.mxu0 %v5770_v24 }
 0x452   :  { %4980 = vmatprep.subr.bf16.mxu0 %v5599_v3 }
 0x454   :  { %v1185_v33 = vpop.f32.mrb[12].mxu1 }
 0x455   :  { %v1186_v35 = vadd.f32 %v1185_v33, %v1115_v17  ;;  %v3883_v38 = vpop.f32.mrb[13].mxu1  ;;  %4982 = vmatpush3.bf16.msra.mxu0 %v5778_v30 }
 0x456   :  { %4983 = vmatprep.subr.bf16.mxu0 %v5599_v3 }
 0x457   :  { %v1189_v40 = vadd.f32 %v5904_v56, %v1186_v35 }
 0x459   :  { %5431 = vtanh.f32 %v1189_v40  ;;  %4985 = vmatpush3.bf16.msra.mxu0 %v5786_v36 }
 0x45a   :  { %4986 = vmatprep.subr.bf16.mxu0 %v5599_v3 }
 0x45d   :  { %4988 = vmatpush3.bf16.msra.mxu0 %v5794_v42 }
 0x45e   :  { %4989 = vmatprep.subr.bf16.mxu0 %v5599_v3 }
 0x461   :  { %4991 = vmatpush3.bf16.msra.mxu0 %v5802_v48 }
 0x462   :  { %5016 = vmatprep.subr.bf16.mxu0 %v5599_v3 }
 0x463   :  { %v5432_v41 = vpop.eup %5431 }
 0x464   :  { %3952 = vmatmul.mubr.f32.vlgmr.msra.gmra.mrb[14].mxu1 %v5432_v41  ;;  %3987 = vmatmul.mubr.f32.vlgmr.msra.gmra.mrb[16].mxu0 %v5432_v41 }
 0x465   :  { %4994 = vmatpush3.bf16.msra.mxu1 %v5747_v8  ;;  %4021 = vmatprep.mubr.msk.f32.mxu1 %vm5600_vm0, %v5601_v11 }
 0x466   :  { %4995 = vmatprep.subr.bf16.mxu1 %v5599_v3  ;;  %5018 = vmatpush3.bf16.msra.mxu0 %v5810_v54 }
 0x467   :  { %5019 = vmatprep.subr.bf16.mxu0 %v5599_v3  ;;  %4056 = vmatprep.mubr.msk.f32.mxu0 %vm5600_vm0, %v5601_v11 }
 0x469   :  { %4997 = vmatpush3.bf16.msra.mxu1 %v5758_v13 }
 0x46a   :  { %4998 = vmatprep.subr.bf16.mxu1 %v5599_v3  ;;  %5021 = vmatpush3.bf16.msra.mxu0 %v5819_v61 }
 0x46b   :  { %5022 = vmatprep.subr.bf16.mxu0 %v5599_v3 }
 0x46d   :  { %5000 = vmatpush3.bf16.msra.mxu1 %v5766_v19 }
 0x46e   :  { %5001 = vmatprep.subr.bf16.mxu1 %v5599_v3  ;;  %5024 = vmatpush3.bf16.msra.mxu0 %v5831_v5 }
 0x46f   :  { %5025 = vmatprep.subr.bf16.mxu0 %v5599_v3 }
 0x471   :  { %5003 = vmatpush3.bf16.msra.mxu1 %v5774_v25 }
 0x472   :  { %5004 = vmatprep.subr.bf16.mxu1 %v5599_v3  ;;  %5027 = vmatpush3.bf16.msra.mxu0 %v5839_v15 }
 0x473   :  { %5028 = vmatprep.subr.bf16.mxu0 %v5599_v3 }
 0x475   :  { %5006 = vmatpush3.bf16.msra.mxu1 %v5782_v31 }
 0x476   :  { %5007 = vmatprep.subr.bf16.mxu1 %v5599_v3  ;;  %5030 = vmatpush3.bf16.msra.mxu0 %v5847_v21 }
 0x477   :  { %5031 = vmatprep.subr.bf16.mxu0 %v5599_v3 }
 0x479   :  { %5009 = vmatpush3.bf16.msra.mxu1 %v5790_v37 }
 0x47a   :  { %5010 = vmatprep.subr.bf16.mxu1 %v5599_v3  ;;  %5033 = vmatpush3.bf16.msra.mxu0 %v5853_v26 }
 0x47b   :  { %5034 = vmatprep.subr.bf16.mxu0 %v5599_v3 }
 0x47d   :  { %5012 = vmatpush3.bf16.msra.mxu1 %v5798_v43 }
 0x47e   :  { %5013 = vmatprep.subr.bf16.mxu1 %v5599_v3  ;;  %5036 = vmatpush3.bf16.msra.mxu0 %v5857_v29 }
 0x47f   :  { %5037 = vmatprep.subr.bf16.mxu0 %v5599_v3 }
 0x481   :  { %5015 = vmatpush3.bf16.msra.mxu1 %v5806_v49 }
 0x482   :  { %5039 = vmatpush3.bf16.msra.mxu0 %v5861_v34  ;;  %5040 = vmatprep.subr.bf16.mxu1 %v5599_v3 }
 0x483   :  { %5064 = vmatprep.subr.bf16.mxu0 %v5599_v3 }
 0x484   :  { %4022 = vmatmul.mubr.f32.vlgmr.msra.gmra.mrb[16].mxu1 %v6170_v45 }
 0x485   :  { %5042 = vmatpush3.bf16.msra.mxu1 %v5815_v58  ;;  %4091 = vmatprep.mubr.msk.f32.mxu1 %vm5600_vm0, %v5601_v11 }
 0x486   :  { %5043 = vmatprep.subr.bf16.mxu1 %v5599_v3 }
 0x489   :  { %5045 = vmatpush3.bf16.msra.mxu1 %v5825_v0 }
 0x48a   :  { %5046 = vmatprep.subr.bf16.mxu1 %v5599_v3 }
 0x48d   :  { %5048 = vmatpush3.bf16.msra.mxu1 %v5835_v9 }
 0x48e   :  { %5049 = vmatprep.subr.bf16.mxu1 %v5599_v3 }
 0x491   :  { %5051 = vmatpush3.bf16.msra.mxu1 %v5843_v20 }
 0x492   :  { %5052 = vmatprep.subr.bf16.mxu1 %v5599_v3 }
 0x495   :  { %5054 = vmatpush3.bf16.msra.mxu1 %v5885_v39 }
 0x496   :  { %5055 = vmatprep.subr.bf16.mxu1 %v5599_v3 }
 0x499   :  { %5057 = vmatpush3.bf16.msra.mxu1 %v5889_v44 }
 0x49a   :  { %5058 = vmatprep.subr.bf16.mxu1 %v5599_v3 }
 0x49d   :  { %5060 = vmatpush3.bf16.msra.mxu1 %v5893_v50 }
 0x49e   :  { %5061 = vmatprep.subr.bf16.mxu1 %v5599_v3 }
 0x4a1   :  { %5063 = vmatpush3.bf16.msra.mxu1 %v5896_v52 }
 0x4a2   :  { %5088 = vmatprep.subr.bf16.mxu1 %v5599_v3 }
 0x517   :  { %v1257_v46 = vpop.f32.mrb[14].mxu0 }
 0x518   :  { %v3918_v47 = vpop.f32.mrb[15].mxu0 }
 0x537   :  { %v1327_v51 = vpop.f32.mrb[14].mxu1  ;;  %v1401_v53 = vpop.f32.mrb[16].mxu0 }
 0x538   :  { %v1328_v55 = vadd.f32 %v1327_v51, %v1257_v46  ;;  %v3953_v57 = vpop.f32.mrb[15].mxu1  ;;  %v3988_v59 = vpop.f32.mrb[17].mxu0 }
 0x53a   :  { %v1331_v60 = vadd.f32 %v5964_v10, %v1328_v55 }
 0x53c   :  { %5433 = vtanh.f32 %v1331_v60 }
 0x546   :  { %v5434_v62 = vpop.eup %5433 }
 0x547   :  { %4057 = vmatmul.mubr.f32.vlgmr.msra.gmra.mrb[18].mxu0 %v5434_v62 }
 0x548   :  { %5066 = vmatpush3.bf16.msra.mxu0 %v5745_v4  ;;  %4126 = vmatprep.mubr.msk.f32.mxu0 %vm5600_vm0, %v5601_v11 }
 0x549   :  { %5067 = vmatprep.subr.bf16.mxu0 %v5599_v3 }
 0x54c   :  { %5069 = vmatpush3.bf16.msra.mxu0 %v5754_v12 }
 0x54d   :  { %5070 = vmatprep.subr.bf16.mxu0 %v5599_v3 }
 0x550   :  { %5072 = vmatpush3.bf16.msra.mxu0 %v5762_v18 }
 0x551   :  { %5073 = vmatprep.subr.bf16.mxu0 %v5599_v3 }
 0x554   :  { %5075 = vmatpush3.bf16.msra.mxu0 %v5770_v24 }
 0x555   :  { %5076 = vmatprep.subr.bf16.mxu0 %v5599_v3 }
 0x557   :  { %v1471_v63 = vpop.f32.mrb[16].mxu1 }
 0x558   :  { %v1472_v1 = vadd.f32 %v1471_v63, %v1401_v53  ;;  %v4023_v2 = vpop.f32.mrb[17].mxu1  ;;  %5078 = vmatpush3.bf16.msra.mxu0 %v5778_v30 }
 0x559   :  { %5079 = vmatprep.subr.bf16.mxu0 %v5599_v3 }
 0x55a   :  { %v1475_v7 = vadd.f32 %v5904_v56, %v1472_v1 }
 0x55c   :  { %5435 = vtanh.f32 %v1475_v7  ;;  %5081 = vmatpush3.bf16.msra.mxu0 %v5786_v36 }
 0x55d   :  { %5082 = vmatprep.subr.bf16.mxu0 %v5599_v3 }
 0x560   :  { %5084 = vmatpush3.bf16.msra.mxu0 %v5794_v42 }
 0x561   :  { %5085 = vmatprep.subr.bf16.mxu0 %v5599_v3 }
 0x564   :  { %5087 = vmatpush3.bf16.msra.mxu0 %v5802_v48 }
 0x565   :  { %5112 = vmatprep.subr.bf16.mxu0 %v5599_v3 }
 0x566   :  { %v5436_v14 = vpop.eup %5435 }
 0x567   :  { %4092 = vmatmul.mubr.f32.vlgmr.msra.gmra.mrb[18].mxu1 %v5436_v14  ;;  %4127 = vmatmul.mubr.f32.vlgmr.msra.gmra.mrb[20].mxu0 %v5436_v14  ;;  %v2502_v14 = vld [vmem:[#allocation10 + $0xc8] sm:$0xff] }
 0x568   :  { %5090 = vmatpush3.bf16.msra.mxu1 %v5747_v8  ;;  %4161 = vmatprep.mubr.msk.f32.mxu1 %vm5600_vm0, %v5601_v11 }
 0x569   :  { %5091 = vmatprep.subr.bf16.mxu1 %v5599_v3  ;;  %5114 = vmatpush3.bf16.msra.mxu0 %v5810_v54 }
 0x56a   :  { %5115 = vmatprep.subr.bf16.mxu0 %v5599_v3  ;;  %4196 = vmatprep.mubr.msk.f32.mxu0 %vm5600_vm0, %v5601_v11 }
 0x56c   :  { %5093 = vmatpush3.bf16.msra.mxu1 %v5758_v13 }
 0x56d   :  { %5094 = vmatprep.subr.bf16.mxu1 %v5599_v3  ;;  %5117 = vmatpush3.bf16.msra.mxu0 %v5819_v61 }
 0x56e   :  { %5118 = vmatprep.subr.bf16.mxu0 %v5599_v3 }
 0x570   :  { %5096 = vmatpush3.bf16.msra.mxu1 %v5766_v19 }
 0x571   :  { %5097 = vmatprep.subr.bf16.mxu1 %v5599_v3  ;;  %5120 = vmatpush3.bf16.msra.mxu0 %v5831_v5 }
 0x572   :  { %5121 = vmatprep.subr.bf16.mxu0 %v5599_v3 }
 0x574   :  { %5099 = vmatpush3.bf16.msra.mxu1 %v5774_v25 }
 0x575   :  { %5100 = vmatprep.subr.bf16.mxu1 %v5599_v3  ;;  %5123 = vmatpush3.bf16.msra.mxu0 %v5839_v15 }
 0x576   :  { %5124 = vmatprep.subr.bf16.mxu0 %v5599_v3 }
 0x578   :  { %5102 = vmatpush3.bf16.msra.mxu1 %v5782_v31 }
 0x579   :  { %5103 = vmatprep.subr.bf16.mxu1 %v5599_v3  ;;  %5126 = vmatpush3.bf16.msra.mxu0 %v5847_v21 }
 0x57a   :  { %5127 = vmatprep.subr.bf16.mxu0 %v5599_v3 }
 0x57c   :  { %5105 = vmatpush3.bf16.msra.mxu1 %v5790_v37 }
 0x57d   :  { %5106 = vmatprep.subr.bf16.mxu1 %v5599_v3  ;;  %5129 = vmatpush3.bf16.msra.mxu0 %v5853_v26 }
 0x57e   :  { %5130 = vmatprep.subr.bf16.mxu0 %v5599_v3 }
 0x580   :  { %5108 = vmatpush3.bf16.msra.mxu1 %v5798_v43 }
 0x581   :  { %5109 = vmatprep.subr.bf16.mxu1 %v5599_v3  ;;  %5132 = vmatpush3.bf16.msra.mxu0 %v5857_v29 }
 0x582   :  { %5133 = vmatprep.subr.bf16.mxu0 %v5599_v3 }
 0x584   :  { %5111 = vmatpush3.bf16.msra.mxu1 %v5806_v49 }
 0x585   :  { %5135 = vmatpush3.bf16.msra.mxu0 %v5861_v34  ;;  %5136 = vmatprep.subr.bf16.mxu1 %v5599_v3 }
 0x586   :  { %5160 = vmatprep.subr.bf16.mxu0 %v5599_v3 }
 0x587   :  { %4162 = vmatmul.mubr.f32.vlgmr.msra.gmra.mrb[20].mxu1 %v6247_v16 }
 0x588   :  { %5138 = vmatpush3.bf16.msra.mxu1 %v5815_v58  ;;  %4231 = vmatprep.mubr.msk.f32.mxu1 %vm5600_vm0, %v5601_v11 }
 0x589   :  { %5139 = vmatprep.subr.bf16.mxu1 %v5599_v3 }
 0x58c   :  { %5141 = vmatpush3.bf16.msra.mxu1 %v5825_v0 }
 0x58d   :  { %5142 = vmatprep.subr.bf16.mxu1 %v5599_v3 }
 0x590   :  { %5144 = vmatpush3.bf16.msra.mxu1 %v5835_v9 }
 0x591   :  { %5145 = vmatprep.subr.bf16.mxu1 %v5599_v3 }
 0x594   :  { %5147 = vmatpush3.bf16.msra.mxu1 %v5843_v20 }
 0x595   :  { %5148 = vmatprep.subr.bf16.mxu1 %v5599_v3 }
 0x598   :  { %5150 = vmatpush3.bf16.msra.mxu1 %v5885_v39 }
 0x599   :  { %5151 = vmatprep.subr.bf16.mxu1 %v5599_v3 }
 0x59c   :  { %5153 = vmatpush3.bf16.msra.mxu1 %v5889_v44 }
 0x59d   :  { %5154 = vmatprep.subr.bf16.mxu1 %v5599_v3 }
 0x5a0   :  { %5156 = vmatpush3.bf16.msra.mxu1 %v5893_v50 }
 0x5a1   :  { %5157 = vmatprep.subr.bf16.mxu1 %v5599_v3 }
 0x5a4   :  { %5159 = vmatpush3.bf16.msra.mxu1 %v5896_v52 }
 0x5a5   :  { %5184 = vmatprep.subr.bf16.mxu1 %v5599_v3 }
 0x61a   :  { %v1543_v17 = vpop.f32.mrb[18].mxu0 }
 0x61b   :  { %v4058_v22 = vpop.f32.mrb[19].mxu0 }
 0x61c   :  { %v2503_v22 = vld [vmem:[#allocation10 + $0xd0] sm:$0xff] }
 0x63a   :  { %v1613_v23 = vpop.f32.mrb[18].mxu1  ;;  %v1687_v27 = vpop.f32.mrb[20].mxu0 }
 0x63b   :  { %v1614_v28 = vadd.f32 %v1613_v23, %v1543_v17  ;;  %v4093_v32 = vpop.f32.mrb[19].mxu1  ;;  %v4128_v33 = vpop.f32.mrb[21].mxu0  ;;  %v2504_v23 = vld [vmem:[#allocation10 + $0xd8] sm:$0xff] }
 0x63c   :  { %v2506_v32 = vld [vmem:[#allocation10 + $0xe8] sm:$0xff] }
 0x63d   :  { %v1617_v35 = vadd.f32 %v5964_v10, %v1614_v28  ;;  %v2505_v28 = vld [vmem:[#allocation10 + $0xe0] sm:$0xff] }
 0x63e   :  { %v5371_v33 = vpack.c.bf16 %v2506_v32, %v2505_v28 }
 0x63f   :  { %5437 = vtanh.f32 %v1617_v35  ;;  %v2507_v35 = vld [vmem:[#allocation10 + $0xf0] sm:$0xff] }
 0x649   :  { %v5438_v38 = vpop.eup %5437 }
 0x64a   :  { %4197 = vmatmul.mubr.f32.vlgmr.msra.gmra.mrb[22].mxu0 %v5438_v38  ;;  %v2508_v38 = vld [vmem:[#allocation10 + $0xf8] sm:$0xff] }
 0x64b   :  { %5162 = vmatpush3.bf16.msra.mxu0 %v5745_v4  ;;  %4266 = vmatprep.mubr.msk.f32.mxu0 %vm5600_vm0, %v5601_v11 }
 0x64c   :  { %5163 = vmatprep.subr.bf16.mxu0 %v5599_v3 }
 0x64f   :  { %5165 = vmatpush3.bf16.msra.mxu0 %v5754_v12 }
 0x650   :  { %5166 = vmatprep.subr.bf16.mxu0 %v5599_v3 }
 0x653   :  { %5168 = vmatpush3.bf16.msra.mxu0 %v5762_v18 }
 0x654   :  { %5169 = vmatprep.subr.bf16.mxu0 %v5599_v3 }
 0x657   :  { %5171 = vmatpush3.bf16.msra.mxu0 %v5770_v24 }
 0x658   :  { %5172 = vmatprep.subr.bf16.mxu0 %v5599_v3 }
 0x65a   :  { %v1757_v40 = vpop.f32.mrb[20].mxu1 }
 0x65b   :  { %v1758_v41 = vadd.f32 %v1757_v40, %v1687_v27  ;;  %v4163_v46 = vpop.f32.mrb[21].mxu1  ;;  %5174 = vmatpush3.bf16.msra.mxu0 %v5778_v30  ;;  %v5368_v27 = vpack.c.bf16 %v2504_v23, %v2503_v22  ;;  %v5374_v40 = vpack.c.bf16 %v2508_v38, %v2507_v35  ;;  %v5461_v22 = vld [vmem:[#allocation6] sm:$0xff]  ;;  %v2815_v35 = vld [vmem:[%s6520_s10] ss:$0 sm:$0xff]  ;;  %s105_s10 = sld [smem:[#allocation2]] }
 0x65c   :  { %5175 = vmatprep.subr.bf16.mxu0 %v5599_v3 }
 0x65d   :  { %v1761_v47 = vadd.f32 %v5904_v56, %v1758_v41  ;;  %v6324_v56 = vld [vmem:[#allocation6 + $0x30] sm:$0xff] }
 0x65e   :  { %v5459_v41 = vld [vmem:[#allocation6 + $0x10] sm:$0xff] }
 0x65f   :  { %5439 = vtanh.f32 %v1761_v47  ;;  %5177 = vmatpush3.bf16.msra.mxu0 %v5786_v36 }
 0x660   :  { %5178 = vmatprep.subr.bf16.mxu0 %v5599_v3 }
 0x661   :  { %s2761_s17 = smul.f32 %s2805_s3, %s105_s10 }
 0x663   :  { %5180 = vmatpush3.bf16.msra.mxu0 %v5794_v42 }
 0x664   :  { %5181 = vmatprep.subr.bf16.mxu0 %v5599_v3 }
 0x667   :  { %5183 = vmatpush3.bf16.msra.mxu0 %v5802_v48 }
 0x668   :  { %5208 = vmatprep.subr.bf16.mxu0 %v5599_v3 }
 0x669   :  { %v5440_v51 = vpop.eup %5439 }
 0x66a   :  { %4232 = vmatmul.mubr.f32.vlgmr.msra.gmra.mrb[22].mxu1 %v5440_v51  ;;  %4267 = vmatmul.mubr.f32.vlgmr.msra.gmra.mrb[24].mxu0 %v5440_v51 }
 0x66b   :  { %5186 = vmatpush3.bf16.msra.mxu1 %v5747_v8  ;;  %4301 = vmatprep.mubr.msk.f32.mxu1 %vm5600_vm0, %v5601_v11 }
 0x66c   :  { %5187 = vmatprep.subr.bf16.mxu1 %v5599_v3  ;;  %5210 = vmatpush3.bf16.msra.mxu0 %v5810_v54 }
 0x66d   :  { %5211 = vmatprep.subr.bf16.mxu0 %v5599_v3  ;;  %4336 = vmatprep.mubr.msk.f32.mxu0 %vm5600_vm0, %v5601_v11 }
 0x66f   :  { %5189 = vmatpush3.bf16.msra.mxu1 %v5758_v13 }
 0x670   :  { %5190 = vmatprep.subr.bf16.mxu1 %v5599_v3  ;;  %5213 = vmatpush3.bf16.msra.mxu0 %v5819_v61 }
 0x671   :  { %5214 = vmatprep.subr.bf16.mxu0 %v5599_v3 }
 0x673   :  { %5192 = vmatpush3.bf16.msra.mxu1 %v5766_v19 }
 0x674   :  { %5193 = vmatprep.subr.bf16.mxu1 %v5599_v3  ;;  %5216 = vmatpush3.bf16.msra.mxu0 %v5831_v5 }
 0x675   :  { %5217 = vmatprep.subr.bf16.mxu0 %v5599_v3 }
 0x677   :  { %5195 = vmatpush3.bf16.msra.mxu1 %v5774_v25 }
 0x678   :  { %5196 = vmatprep.subr.bf16.mxu1 %v5599_v3  ;;  %5219 = vmatpush3.bf16.msra.mxu0 %v5839_v15 }
 0x679   :  { %5220 = vmatprep.subr.bf16.mxu0 %v5599_v3 }
 0x67b   :  { %5198 = vmatpush3.bf16.msra.mxu1 %v5782_v31 }
 0x67c   :  { %5199 = vmatprep.subr.bf16.mxu1 %v5599_v3  ;;  %5222 = vmatpush3.bf16.msra.mxu0 %v5847_v21 }
 0x67d   :  { %5223 = vmatprep.subr.bf16.mxu0 %v5599_v3 }
 0x67f   :  { %5201 = vmatpush3.bf16.msra.mxu1 %v5790_v37 }
 0x680   :  { %5202 = vmatprep.subr.bf16.mxu1 %v5599_v3  ;;  %5225 = vmatpush3.bf16.msra.mxu0 %v5853_v26 }
 0x681   :  { %5226 = vmatprep.subr.bf16.mxu0 %v5599_v3 }
 0x683   :  { %5204 = vmatpush3.bf16.msra.mxu1 %v5798_v43 }
 0x684   :  { %5205 = vmatprep.subr.bf16.mxu1 %v5599_v3  ;;  %5228 = vmatpush3.bf16.msra.mxu0 %v5857_v29 }
 0x685   :  { %5229 = vmatprep.subr.bf16.mxu0 %v5599_v3 }
 0x687   :  { %5207 = vmatpush3.bf16.msra.mxu1 %v5806_v49 }
 0x688   :  { %5231 = vmatpush3.bf16.msra.mxu0 %v5861_v34  ;;  %5232 = vmatprep.subr.bf16.mxu1 %v5599_v3 }
 0x689   :  { %5256 = vmatprep.subr.bf16.mxu0 %v5599_v3 }
 0x68a   :  { %4302 = vmatmul.mubr.f32.vlgmr.msra.gmra.mrb[24].mxu1 %v6324_v56 }
 0x68b   :  { %5234 = vmatpush3.bf16.msra.mxu1 %v5815_v58  ;;  %4371 = vmatprep.mubr.msk.f32.mxu1 %vm5600_vm0, %v5601_v11 }
 0x68c   :  { %5235 = vmatprep.subr.bf16.mxu1 %v5599_v3 }
 0x68f   :  { %5237 = vmatpush3.bf16.msra.mxu1 %v5825_v0 }
 0x690   :  { %5238 = vmatprep.subr.bf16.mxu1 %v5599_v3 }
 0x693   :  { %5240 = vmatpush3.bf16.msra.mxu1 %v5835_v9 }
 0x694   :  { %5241 = vmatprep.subr.bf16.mxu1 %v5599_v3 }
 0x697   :  { %5243 = vmatpush3.bf16.msra.mxu1 %v5843_v20 }
 0x698   :  { %5244 = vmatprep.subr.bf16.mxu1 %v5599_v3 }
 0x69b   :  { %5246 = vmatpush3.bf16.msra.mxu1 %v5885_v39 }
 0x69c   :  { %5247 = vmatprep.subr.bf16.mxu1 %v5599_v3 }
 0x69f   :  { %5249 = vmatpush3.bf16.msra.mxu1 %v5889_v44 }
 0x6a0   :  { %5250 = vmatprep.subr.bf16.mxu1 %v5599_v3 }
 0x6a3   :  { %5252 = vmatpush3.bf16.msra.mxu1 %v5893_v50 }
 0x6a4   :  { %5253 = vmatprep.subr.bf16.mxu1 %v5599_v3 }
 0x6a7   :  { %5255 = vmatpush3.bf16.msra.mxu1 %v5896_v52 }
 0x6a8   :  { %5280 = vmatprep.subr.bf16.mxu1 %v5599_v3 }
 0x71d   :  { %v1829_v53 = vpop.f32.mrb[22].mxu0 }
 0x71e   :  { %v4198_v55 = vpop.f32.mrb[23].mxu0 }
 0x73d   :  { %v1899_v57 = vpop.f32.mrb[22].mxu1  ;;  %v1973_v59 = vpop.f32.mrb[24].mxu0 }
 0x73e   :  { %v1900_v60 = vadd.f32 %v1899_v57, %v1829_v53  ;;  %v4233_v62 = vpop.f32.mrb[23].mxu1  ;;  %v4268_v63 = vpop.f32.mrb[25].mxu0 }
 0x73f   :  { %v2582_v62 = vld [vmem:[#allocation10] sm:$0xff]  ;;  %v2583_v63 = vld [vmem:[#allocation10 + $0x8] sm:$0xff] }
 0x740   :  { %v1903_v1 = vadd.f32 %v5964_v10, %v1900_v60 }
 0x742   :  { %5441 = vtanh.f32 %v1903_v1  ;;  %v2584_v1 = vld [vmem:[#allocation10 + $0x10] sm:$0xff] }
 0x74c   :  { %v5442_v2 = vpop.eup %5441 }
 0x74d   :  { %4337 = vmatmul.mubr.f32.vlgmr.msra.gmra.mrb[26].mxu0 %v5442_v2  ;;  %v5377_v2 = vpack.c.bf16 %v2583_v63, %v2582_v62  ;;  %v2762_v62 = vstv %s2761_s17  ;;  %v2765_v63 = vstv %s2805_s3 }
 0x74e   :  { %5258 = vmatpush3.bf16.msra.mxu0 %v5745_v4  ;;  %4406 = vmatprep.mubr.msk.f32.mxu0 %vm5600_vm0, %v5601_v11 }
 0x74f   :  { %5259 = vmatprep.subr.bf16.mxu0 %v5599_v3 }
 0x752   :  { %5261 = vmatpush3.bf16.msra.mxu0 %v5754_v12  ;;  %v6364_v12 = vld [vmem:[%s6515_s5] ss:$0 sm:$0xff] }
 0x753   :  { %5262 = vmatprep.subr.bf16.mxu0 %v5599_v3 }
 0x756   :  { %5264 = vmatpush3.bf16.msra.mxu0 %v5762_v18 }
 0x757   :  { %5265 = vmatprep.subr.bf16.mxu0 %v5599_v3 }
 0x75a   :  { %5267 = vmatpush3.bf16.msra.mxu0 %v5770_v24 }
 0x75b   :  { %5268 = vmatprep.subr.bf16.mxu0 %v5599_v3 }
 0x75d   :  { %v2043_v10 = vpop.f32.mrb[24].mxu1 }
 0x75e   :  { %v2044_v7 = vadd.f32 %v2043_v10, %v1973_v59  ;;  %v4303_v4 = vpop.f32.mrb[25].mxu1  ;;  %5270 = vmatpush3.bf16.msra.mxu0 %v5778_v30  ;;  %v2585_v10 = vld [vmem:[#allocation10 + $0x18] sm:$0xff] }
 0x75f   :  { %5271 = vmatprep.subr.bf16.mxu0 %v5599_v3  ;;  %v5380_v4 = vpack.c.bf16 %v2585_v10, %v2584_v1 }
 0x760   :  { %v2047_v18 = vadd.f32 %v6364_v12, %v2044_v7  ;;  %v5460_v7 = vld [vmem:[#allocation6 + $0x8] sm:$0xff] }
 0x762   :  { %5443 = vtanh.f32 %v2047_v18  ;;  %5273 = vmatpush3.bf16.msra.mxu0 %v5786_v36  ;;  %v2587_v18 = vld [vmem:[#allocation10 + $0x28] sm:$0xff] }
 0x763   :  { %5274 = vmatprep.subr.bf16.mxu0 %v5599_v3 }
 0x766   :  { %5276 = vmatpush3.bf16.msra.mxu0 %v5794_v42  ;;  %v6433_v42 = vld [vmem:[%s6515_s5 + $0x1] ss:$0 sm:$0xff]  ;;  %s5602_s5 = smov 2  }
 0x767   :  { %5277 = vmatprep.subr.bf16.mxu0 %v5599_v3  ;;  %2701 = vrot.lane.b32.xlu1 %v5459_v41, %s5602_s5 }
 0x76a   :  { %5279 = vmatpush3.bf16.msra.mxu0 %v5802_v48 }
 0x76b   :  { %5304 = vmatprep.subr.bf16.mxu0 %v5599_v3  ;;  %2705 = vrot.lane.b32.xlu1 %v6093_v6, %s5603_s2 }
 0x76c   :  { %v5444_v24 = vpop.eup %5443 }
 0x76d   :  { %4372 = vmatmul.mubr.f32.vlgmr.msra.gmra.mrb[26].mxu1 %v5444_v24  ;;  %4407 = vmatmul.mubr.f32.vlgmr.msra.gmra.mrb[28].mxu0 %v5444_v24 }
 0x76e   :  { %5282 = vmatpush3.bf16.msra.mxu1 %v5747_v8  ;;  %4441 = vmatprep.mubr.msk.f32.mxu1 %vm5600_vm0, %v5601_v11  ;;  %v6405_v8 = vld [vmem:[#allocation6 + $0x38] sm:$0xff] }
 0x76f   :  { %5283 = vmatprep.subr.bf16.mxu1 %v5599_v3  ;;  %5306 = vmatpush3.bf16.msra.mxu0 %v5810_v54 }
 0x770   :  { %5307 = vmatprep.subr.bf16.mxu0 %v5599_v3  ;;  %4476 = vmatprep.mubr.msk.f32.mxu0 %vm5600_vm0, %v5601_v11 }
 0x771   :  { %2709 = vrot.lane.b32.xlu1 %v6170_v45, %s5604_s18  ;;  %v2811_v45 = vld [vmem:[%s6516_s6] ss:$0 sm:$0xff]  ;;  %s2806_s6 = sld [smem:[#allocation2 + $0x2]] }
 0x772   :  { %5285 = vmatpush3.bf16.msra.mxu1 %v5758_v13 }
 0x773   :  { %5286 = vmatprep.subr.bf16.mxu1 %v5599_v3  ;;  %5309 = vmatpush3.bf16.msra.mxu0 %v5819_v61 }
 0x774   :  { %5310 = vmatprep.subr.bf16.mxu0 %v5599_v3 }
 0x775   :  { %2713 = vrot.lane.b32.xlu1 %v6247_v16, %s5605_s26 }
 0x776   :  { %5288 = vmatpush3.bf16.msra.mxu1 %v5766_v19 }
 0x777   :  { %5289 = vmatprep.subr.bf16.mxu1 %v5599_v3  ;;  %5312 = vmatpush3.bf16.msra.mxu0 %v5831_v5  ;;  %v2493_v5 = vld [vmem:[#allocation10 + $0x80] sm:$0xff] }
 0x778   :  { %5313 = vmatprep.subr.bf16.mxu0 %v5599_v3 }
 0x779   :  { %2717 = vrot.lane.b32.xlu1 %v6324_v56, %s5606_s1 }
 0x77a   :  { %5291 = vmatpush3.bf16.msra.mxu1 %v5774_v25 }
 0x77b   :  { %5292 = vmatprep.subr.bf16.mxu1 %v5599_v3  ;;  %5315 = vmatpush3.bf16.msra.mxu0 %v5839_v15  ;;  %v2495_v15 = vld [vmem:[#allocation10 + $0x90] sm:$0xff] }
 0x77c   :  { %5316 = vmatprep.subr.bf16.mxu0 %v5599_v3 }
 0x77d   :  { %2721 = vrot.lane.b32.xlu1 %v6405_v8, %s5607_s20 }
 0x77e   :  { %5294 = vmatpush3.bf16.msra.mxu1 %v5782_v31 }
 0x77f   :  { %5295 = vmatprep.subr.bf16.mxu1 %v5599_v3  ;;  %5318 = vmatpush3.bf16.msra.mxu0 %v5847_v21  ;;  %v2496_v21 = vld [vmem:[#allocation10 + $0x98] sm:$0xff] }
 0x780   :  { %5319 = vmatprep.subr.bf16.mxu0 %v5599_v3 }
 0x781   :  { %2772 = vrot.lane.b32.xlu1 %v6405_v8, %s5603_s2 }
 0x782   :  { %5297 = vmatpush3.bf16.msra.mxu1 %v5790_v37 }
 0x783   :  { %5298 = vmatprep.subr.bf16.mxu1 %v5599_v3  ;;  %5321 = vmatpush3.bf16.msra.mxu0 %v5853_v26  ;;  %v5356_v26 = vpack.c.bf16 %v2496_v21, %v2495_v15 }
 0x784   :  { %5322 = vmatprep.subr.bf16.mxu0 %v5599_v3 }
 0x786   :  { %5300 = vmatpush3.bf16.msra.mxu1 %v5798_v43 }
 0x787   :  { %5301 = vmatprep.subr.bf16.mxu1 %v5599_v3  ;;  %5324 = vmatpush3.bf16.msra.mxu0 %v5857_v29  ;;  %v2497_v29 = vld [vmem:[#allocation10 + $0xa0] sm:$0xff] }
 0x788   :  { %5325 = vmatprep.subr.bf16.mxu0 %v5599_v3 }
 0x78a   :  { %5303 = vmatpush3.bf16.msra.mxu1 %v5806_v49 }
 0x78b   :  { %5327 = vmatpush3.bf16.msra.mxu0 %v5861_v34  ;;  %5328 = vmatprep.subr.bf16.mxu1 %v5599_v3  ;;  %v2498_v34 = vld [vmem:[#allocation10 + $0xa8] sm:$0xff] }
 0x78c   :  { %5352 = vmatprep.subr.bf16.mxu0 %v5599_v3 }
 0x78d   :  { %4442 = vmatmul.mubr.f32.vlgmr.msra.gmra.mrb[28].mxu1 %v6405_v8 }
 0x78e   :  { %5330 = vmatpush3.bf16.msra.mxu1 %v5815_v58  ;;  %4511 = vmatprep.mubr.msk.f32.mxu1 %vm5600_vm0, %v5601_v11 }
 0x78f   :  { %5331 = vmatprep.subr.bf16.mxu1 %v5599_v3 }
 0x792   :  { %5333 = vmatpush3.bf16.msra.mxu1 %v5825_v0 }
 0x793   :  { %5334 = vmatprep.subr.bf16.mxu1 %v5599_v3 }
 0x796   :  { %5336 = vmatpush3.bf16.msra.mxu1 %v5835_v9  ;;  %v2494_v9 = vld [vmem:[#allocation10 + $0x88] sm:$0xff] }
 0x797   :  { %5337 = vmatprep.subr.bf16.mxu1 %v5599_v3 }
 0x79a   :  { %5339 = vmatpush3.bf16.msra.mxu1 %v5843_v20  ;;  %v5353_v20 = vpack.c.bf16 %v2494_v9, %v2493_v5  ;;  %v2487_v9 = vstv %s2806_s6 }
 0x79b   :  { %5340 = vmatprep.subr.bf16.mxu1 %v5599_v3 }
 0x79e   :  { %5342 = vmatpush3.bf16.msra.mxu1 %v5885_v39  ;;  %v5359_v39 = vpack.c.bf16 %v2498_v34, %v2497_v29  ;;  %v2813_v29 = vld [vmem:[%s6518_s8] ss:$0 sm:$0xff] }
 0x79f   :  { %5343 = vmatprep.subr.bf16.mxu1 %v5599_v3  ;;  %v2814_v34 = vld [vmem:[%s6519_s9] ss:$0 sm:$0xff]  ;;  %s5609_s9 = smov 126  }
 0x7a2   :  { %5345 = vmatpush3.bf16.msra.mxu1 %v5889_v44  ;;  %v2499_v44 = vld [vmem:[#allocation10 + $0xb0] sm:$0xff] }
 0x7a3   :  { %5346 = vmatprep.subr.bf16.mxu1 %v5599_v3 }
 0x7a6   :  { %5348 = vmatpush3.bf16.msra.mxu1 %v5893_v50 }
 0x7a7   :  { %5349 = vmatprep.subr.bf16.mxu1 %v5599_v3 }
 0x7aa   :  { %5351 = vmatpush3.bf16.msra.mxu1 %v5896_v52  ;;  %v2501_v52 = vld [vmem:[#allocation10 + $0xc0] sm:$0xff] }
 0x7ab   :  { %5376 = vmatprep.subr.bf16.mxu1 %v5599_v3  ;;  %v5365_v17 = vpack.c.bf16 %v2502_v14, %v2501_v52 }
 0x7d9   :  { %v2702_v15 = vpop.permute.xlu1 %2701 }
 0x820   :  { %v2115_v13 = vpop.f32.mrb[26].mxu0 }
 0x821   :  { %v4338_v19 = vpop.f32.mrb[27].mxu0 }
 0x822   :  { %v2589_v19 = vld [vmem:[#allocation10 + $0x38] sm:$0xff] }
 0x840   :  { %v2185_v25 = vpop.f32.mrb[26].mxu1  ;;  %v2259_v30 = vpop.f32.mrb[28].mxu0 }
 0x841   :  { %v2186_v31 = vadd.f32 %v2185_v25, %v2115_v13  ;;  %v4373_v36 = vpop.f32.mrb[27].mxu1  ;;  %v4408_v37 = vpop.f32.mrb[29].mxu0  ;;  %v2588_v13 = vld [vmem:[#allocation10 + $0x30] sm:$0xff] }
 0x842   :  { %v5386_v25 = vpack.c.bf16 %v2589_v19, %v2588_v13  ;;  %v2592_v37 = vld [vmem:[#allocation10 + $0x50] sm:$0xff] }
 0x843   :  { %v2189_v43 = vadd.f32 %v6433_v42, %v2186_v31  ;;  %v2591_v31 = vld [vmem:[#allocation10 + $0x48] sm:$0xff] }
 0x845   :  { %5445 = vtanh.f32 %v2189_v43 }
 0x84f   :  { %v5446_v48 = vpop.eup %5445 }
 0x850   :  { %4477 = vmatmul.mubr.f32.vlgmr.msra.gmra.mrb[30].mxu0 %v5446_v48  ;;  %v2594_v48 = vld [vmem:[#allocation10 + $0x60] sm:$0xff] }
 0x851   :  { %4546 = vmatprep.mubr.msk.f32.mxu0 %vm5600_vm0, %v5601_v11  ;;  %5354 = vmatpush3.bf16.msra.mxu0 %v5353_v20  ;;  %v2812_v20 = vld [vmem:[%s6517_s7] ss:$0 sm:$0xff] }
 0x852   :  { %5355 = vmatprep.subr.bf16.mxu0 %v5599_v3 }
 0x855   :  { %5357 = vmatpush3.bf16.msra.mxu0 %v5356_v26 }
 0x856   :  { %5358 = vmatprep.subr.bf16.mxu0 %v5599_v3 }
 0x859   :  { %5360 = vmatpush3.bf16.msra.mxu0 %v5359_v39 }
 0x85a   :  { %5361 = vmatprep.subr.bf16.mxu0 %v5599_v3 }
 0x860   :  { %v2329_v49 = vpop.f32.mrb[28].mxu1 }
 0x861   :  { %v2330_v54 = vadd.f32 %v2329_v49, %v2259_v30  ;;  %v4443_v58 = vpop.f32.mrb[29].mxu1  ;;  %v2590_v30 = vld [vmem:[#allocation10 + $0x40] sm:$0xff]  ;;  %v2595_v49 = vld [vmem:[#allocation10 + $0x68] sm:$0xff] }
 0x862   :  { %v5389_v36 = vpack.c.bf16 %v2591_v31, %v2590_v30  ;;  %v2596_v58 = vld [vmem:[#allocation10 + $0x70] sm:$0xff] }
 0x863   :  { %v2333_v61 = vadd.f32 %v6364_v12, %v2330_v54  ;;  %v2586_v12 = vld [vmem:[#allocation10 + $0x20] sm:$0xff]  ;;  %v5395_v54 = vpack.c.bf16 %v2595_v49, %v2594_v48 }
 0x864   :  { %v5383_v24 = vpack.c.bf16 %v2587_v18, %v2586_v12 }
 0x865   :  { %5447 = vtanh.f32 %v2333_v61  ;;  %v2597_v61 = vld [vmem:[#allocation10 + $0x78] sm:$0xff] }
 0x866   :  { %v5398_v5 = vpack.c.bf16 %v2597_v61, %v2596_v58 }
 0x86f   :  { %v6439_v0 = vpop.eup %5447 }
 0x870   :  { %4512 = vmatmul.mubr.f32.vlgmr.msra.gmra.mrb[30].mxu1 %v6439_v0 }
 0x871   :  { %4581 = vmatprep.mubr.msk.f32.mxu1 %vm5600_vm0, %v5601_v11  ;;  %v2500_v11 = vld [vmem:[#allocation10 + $0xb8] sm:$0xff]  ;;  %5378 = vmatpush3.bf16.msra.mxu1 %v5377_v2 }
 0x872   :  { %v5362_v50 = vpack.c.bf16 %v2500_v11, %v2499_v44  ;;  %5379 = vmatprep.subr.bf16.mxu1 %v5599_v3  ;;  %v2706_v44 = vpop.permute.xlu1 %2705 }
 0x874   :  { %5363 = vmatpush3.bf16.msra.mxu0 %v5362_v50 }
 0x875   :  { %5364 = vmatprep.subr.bf16.mxu0 %v5599_v3  ;;  %5381 = vmatpush3.bf16.msra.mxu1 %v5380_v4 }
 0x876   :  { %5382 = vmatprep.subr.bf16.mxu1 %v5599_v3  ;;  %v2710_v50 = vpop.permute.xlu1 %2709 }
 0x878   :  { %5366 = vmatpush3.bf16.msra.mxu0 %v5365_v17 }
 0x879   :  { %5367 = vmatprep.subr.bf16.mxu0 %v5599_v3  ;;  %5384 = vmatpush3.bf16.msra.mxu1 %v5383_v24 }
 0x87a   :  { %5385 = vmatprep.subr.bf16.mxu1 %v5599_v3  ;;  %v2714_v52 = vpop.permute.xlu1 %2713 }
 0x87c   :  { %5369 = vmatpush3.bf16.msra.mxu0 %v5368_v27 }
 0x87d   :  { %5370 = vmatprep.subr.bf16.mxu0 %v5599_v3  ;;  %5387 = vmatpush3.bf16.msra.mxu1 %v5386_v25 }
 0x87e   :  { %5388 = vmatprep.subr.bf16.mxu1 %v5599_v3  ;;  %v2718_v14 = vpop.permute.xlu1 %2717 }
 0x880   :  { %5372 = vmatpush3.bf16.msra.mxu0 %v5371_v33 }
 0x881   :  { %5373 = vmatprep.subr.bf16.mxu0 %v5599_v3  ;;  %5390 = vmatpush3.bf16.msra.mxu1 %v5389_v36  ;;  %v2694_v36 = vstv %s2807_s4 }
 0x882   :  { %5391 = vmatprep.subr.bf16.mxu1 %v5599_v3  ;;  %v2722_v38 = vpop.permute.xlu1 %2721 }
 0x884   :  { %5375 = vmatpush3.bf16.msra.mxu0 %v5374_v40 }
 0x886   :  { %v2773_v13 = vpop.permute.xlu1 %2772 }
 0x923   :  { %v2401_v46 = vpop.f32.mrb[30].mxu0 }
 0x924   :  { %v4478_v47 = vpop.f32.mrb[31].mxu0 }
 0x943   :  { %v2471_v51 = vpop.f32.mrb[30].mxu1 }
 0x944   :  { %v2472_v53 = vadd.f32 %v2471_v51, %v2401_v46  ;;  %v4513_v55 = vpop.f32.mrb[31].mxu1  ;;  %v2579_v51 = vmul.f32 %v6439_v0, %v6439_v0 }
 0x946   :  { %v2475_v6 = vadd.f32 %v6433_v42, %v2472_v53  ;;  %v2593_v42 = vld [vmem:[#allocation10 + $0x58] sm:$0xff]  ;;  %v2580_v53 = vsub.f32 1.0, %v2579_v51 }
 0x947   :  { %v5392_v43 = vpack.c.bf16 %v2593_v42, %v2592_v37 }
 0x948   :  { %5449 = vtanh.f32 %v2475_v6 }
 0x949   :  { %5393 = vmatpush3.bf16.msra.mxu1 %v5392_v43 }
 0x94a   :  { %5394 = vmatprep.subr.bf16.mxu1 %v5599_v3 }
 0x94d   :  { %5396 = vmatpush3.bf16.msra.mxu1 %v5395_v54 }
 0x94e   :  { %5397 = vmatprep.subr.bf16.mxu1 %v5599_v3 }
 0x951   :  { %5399 = vmatpush3.bf16.msra.mxu1 %v5398_v5 }
 0x952   :  { %v5450_v16 = vpop.eup %5449 }
 0x953   :  { %v2484_v57 = vmul.f32 %v5450_v16, %v2811_v45  ;;  %v2489_v56 = vmul.f32 %v5450_v16, %v5450_v16 }
 0x955   :  { %v2490_v59 = vsub.f32 1.0, %v2489_v56  ;;  %2485 = vadd.xlane.f32.xlu0 %v2484_v57  ;;  %v2750_v56 = vsub.f32 %v6405_v8, %v5461_v22 }
 0x957   :  { %v2491_v60 = vmul.f32 %v2811_v45, %v2490_v59  ;;  %v2752_v59 = vmul.f32 0.14285715, %v2750_v56 }
 0x959   :  { %4547 = vmatmul.mubr.f32.vlgmr.msra.gmra.mrb[32].mxu0 %v2491_v60  ;;  %5451 = vrsqrt.f32 %v2752_v59  ;;  %vm2755_vm9 = vcmp.eq.f32.partialorder %v2752_v59, inf  ;;  %v2758_v1 = vand.u32 2147483648, %v2752_v59  ;;  %vm2757_vm10 = vcmp.eq.f32.partialorder %v2752_v59, 0.0 }
 0x95a   :  { %5453 = vrcp.f32 %v2762_v62 }
 0x95b   :  { %5455 = vrcp.f32 %v2765_v63 }
 0x963   :  { %v5452_v60 = vpop.eup %5451 }
 0x964   :  { %v2754_v0 = vmul.f32 %v5452_v60, %v2752_v59  ;;  %v5454_v4 = vpop.eup %5453 }
 0x966   :  { %v2756_v2 = vsel %vm2755_vm9, %v2752_v59, %v2754_v0 }
 0x967   :  { %v2759_v10 = vsel %vm2757_vm10, %v2758_v1, %v2756_v2 }
 0x968   :  { %v2760_v12 = vsub.f32 0.0, %v2759_v10 }
 0x96a   :  { %v2764_v18 = vmul.f32 %v5454_v4, %v2760_v12 }
 0x96b   :  { %2697 = vrot.lane.b32.xlu0 %v5460_v7, %s5608_s12 }
 0x96c   :  { %v2775_v25 = vmul.f32 %v2773_v13, %v2764_v18 }
 0x9e2   :  { %v2486_v21 = vpop.xlane.xlu0 %2485 }
 0x9e3   :  { %v6472_v26 = vadd.f32 %v2487_v9, %v2486_v21 }
 0x9e5   :  { %v2675_v3 = vmul.f32 %v2812_v20, %v6472_v26 }
 0x9e6   :  { %v2698_v17 = vpop.permute.xlu0 %2697 }
 0x9e7   :  { %v2683_v39 = vadd.f32 %v2813_v29, %v2675_v3  ;;  %v2725_v23 = vsel %vm2724_vm1, %v5461_v22, %v2698_v17 }
 0x9e8   :  { %v2727_v27 = vsel %vm2726_vm2, %v2725_v23, %v2702_v15 }
 0x9e9   :  { %v2691_v11 = vmul.f32 %v2814_v34, %v2683_v39  ;;  %v2729_v28 = vsel %vm2728_vm3, %v2727_v27, %v2706_v44 }
 0x9ea   :  { %v2731_v32 = vsel %vm2730_vm4, %v2729_v28, %v2710_v50 }
 0x9eb   :  { %2692 = vadd.xlane.f32.xlu1 %v2691_v11  ;;  %v2733_v33 = vsel %vm2732_vm5, %v2731_v32, %v2714_v52 }
 0x9ec   :  { %v2735_v40 = vsel %vm2734_vm6, %v2733_v33, %v2718_v14 }
 0x9ed   :  { %v2737_v41 = vsel %vm2736_vm7, %v2735_v40, %v2722_v38 }
 0x9ee   :  { %v2745_v46 = vmul.f32 %v2815_v35, %v2737_v41 }
 0x9f0   :  { %v2747_v47 = vsel %vm2746_vm8, %v2745_v46, 0.0 }
 0x9f1   :  { %2748 = vadd.xlane.f32.xlu0 %v2747_v47 }
 0xa07   :  { %2768 = vrot.lane.b32.xlu0 %v6405_v8, %s5602_s5  ;;  %v5456_v8 = vpop.eup %5455 }
 0xa08   :  { %v2767_v24 = vmul.f32 %v5456_v8, %v2759_v10 }
 0xa2c   :  { %v2575_v55 = vpop.f32.mrb[32].mxu0 }
 0xa2d   :  { %v2581_v6 = vmul.f32 %v2580_v53, %v2575_v55  ;;  %v4548_v45 = vpop.f32.mrb[33].mxu0 }
 0xa2f   :  { %4582 = vmatmul.mubr.f32.vlgmr.msra.gmra.mrb[32].mxu1 %v2581_v6 }
 0xa78   :  { %v2693_v31 = vpop.xlane.xlu1 %2692 }
 0xa79   :  { %v2695_v42 = vadd.f32 %v2694_v36, %v2693_v31 }
 0xa7e   :  { %v2749_v7 = vpop.xlane.xlu0 %2748 }
 0xa82   :  { %v2769_v19 = vpop.permute.xlu0 %2768 }
 0xa83   :  { %v2771_v30 = vmul.f32 %v2769_v19, %v2767_v24 }
 0xa85   :  { %v2776_v37 = vadd.f32 %v2775_v25, %v2771_v30 }
 0xa87   :  { %v2777_v48 = vsub.f32 %v2776_v37, %v2749_v7 }
 0xb02   :  { %v2664_v16 = vpop.f32.mrb[32].mxu1 }
 0xb03   :  { %v4583_v57 = vpop.f32.mrb[33].mxu1  ;;  %2779 = vrot.lane.b32.xlu1 %v2664_v16, %s5609_s9 }
 0xb75   :  { %v2780_v43 = vpop.permute.xlu1 %2779 }
 0xb76   :  { %v2782_v49 = vsel %vm2724_vm1, %v6472_v26, %v2780_v43 }
 0xb77   :  { %v2783_v54 = vsel %vm2726_vm2, %v2782_v49, %v2695_v42 }
 0xb78   :  { %v2784_v58 = vsel %vm2728_vm3, %v2783_v54, %v2777_v48 }
 0xb79   :  { %v2785_v61 = vsel %vm2730_vm4, %v2784_v58, 0.0 }
 0xb7a   :  { %2786 = vst [vmem:[#allocation12] sm:$0xff] %v2785_v61 }
 0xb7b   :  { %5571 = shalt.err (!%p5568_p11)
}
 0xb7c   :  { %s5572_s24 = scalar_lea.hbm %s6521_s11, 128 }
 0xb7d   :  { %p5573_p12 = scmp.ne.s32.totalorder %s6521_s11, %s5572_s24  ;;  %p5576_p13 = scmp.lt.u32.totalorder %s5572_s24, %s6521_s11 }
 0xb7f   :  { %p5578_p0 = pnand %p5576_p13, %p5573_p12 }
 0xb81   :  { %5581 = shalt.err (!%p5578_p0)
}
 0xb82   :  { %2796 = dma.vmem_to_hbm [thread:$0]  %s2794_s30, 128, %s6521_s11, [#allocation4]  }
 0xb83   :  { %5590 = dma.done.wait [#allocation4], 128  }
 0xb84   :  { %5591 = vsyncadd [#allocation4], 4294967168 }
 0xb85   :  { %2800 = vsyncpa [#allocation3], 1 }
 0xb86   :  { %2801 = vsyncpa [#allocation8], 1 }
 0xb87   :  { %2802 = vsyncpa [#allocation11], 1 }
 0xb88   :  { %2803 = vsyncpa [#allocation4], 1 }
 0xb89   :  { %2804 = vsyncpa [#allocation5], 1 }

</bundles_post_ra>
